<compile_context>
chip_gen: v6e
topology: v6e:2x2x1
jax: 0.10.0
libtpu: 0.0.40
codegen_flags: <defaults>
</compile_context>

<pallas_src>
import math
import functools

import jax
import jax.numpy as jnp
from jax import lax
from jax.experimental import pallas as pl
from jax.experimental.pallas import tpu as pltpu


# ----------------------------------------------------------------------------
# Pallas kernel
# ----------------------------------------------------------------------------
def _layernorm(x, gamma, beta, eps=1e-5):
    mu = jnp.mean(x, axis=-1, keepdims=True)
    var = jnp.mean((x - mu) ** 2, axis=-1, keepdims=True)
    return (x - mu) * lax.rsqrt(var + eps) * gamma + beta


def transformer_kernel(num_layers, h, dk, b_blk, L, mm_dtype, approx_recip,
                       x_ref, pe_ref,
                       wqkv_ref, bqkv_ref, wo_ref, bo_ref,
                       w1_ref, b1_ref, w2_ref, b2_ref, ln_ref,
                       o_ref,
                       x_scr, attn_scr):
    """One encoder layer for one batch block per grid step; x carried in VMEM scratch."""
    D = h * dk
    rows = b_blk * L
    li = pl.program_id(1)                                     # layer index (grid axis 1)

    # ---- layer 0: load the input block and fuse the positional-encoding add ----
    @pl.when(li == 0)
    def _init():
        xin = x_ref[...].astype(jnp.float32).reshape(b_blk, L, D)
        x_scr[...] = (xin + pe_ref[...][None]).reshape(rows, D)

    x = x_scr[...]                                            # (rows, D) f32

    # ---- fused QKV projection: one (rows, D) @ (D, 3D) MXU matmul ----
    qkv = jnp.dot(x.astype(mm_dtype), wqkv_ref[...],
                  preferred_element_type=jnp.float32) + bqkv_ref[...]
    qkv = qkv.astype(mm_dtype).reshape(b_blk, L, 3 * D)       # single cast per layer

    # ---- attention: per head, batched over the batch block, no concatenates ----
    for hd in range(h):
        c0 = hd * dk
        qh = qkv[:, :, c0:c0 + dk]                            # 1/sqrt(dk) folded into Wq
        kh = qkv[:, :, D + c0:D + c0 + dk]
        vh = qkv[:, :, 2 * D + c0:2 * D + c0 + dk]
        s = jnp.einsum('bqd,bkd->bqk', qh, kh,
                       preferred_element_type=jnp.float32)    # (b_blk, L, L) f32
        s = s - jnp.max(s, axis=-1, keepdims=True)
        p = jnp.exp(s)
        p = p * pl.reciprocal(jnp.sum(p, axis=-1, keepdims=True),
                              approx=approx_recip)
        oh = jnp.einsum('bqk,bkd->bqd', p.astype(mm_dtype), vh,
                        preferred_element_type=jnp.float32)   # (b_blk, L, dk)
        attn_scr[:, c0:c0 + dk] = oh.reshape(rows, dk)        # direct scratch write

    # ---- output projection + residual + LN1 (dropout = identity) ----
    attn = jnp.dot(attn_scr[...].astype(mm_dtype), wo_ref[...],
                   preferred_element_type=jnp.float32) + bo_ref[...]
    ln = ln_ref[...]                                          # (4, D) f32
    x = _layernorm(x + attn, ln[0:1], ln[1:2])

    # ---- feed-forward (ReLU) + residual + LN2 ----
    ff = jnp.maximum(
        jnp.dot(x.astype(mm_dtype), w1_ref[...],
                preferred_element_type=jnp.float32) + b1_ref[...], 0.0)
    ff = jnp.dot(ff.astype(mm_dtype), w2_ref[...],
                 preferred_element_type=jnp.float32) + b2_ref[...]
    x = _layernorm(x + ff, ln[2:3], ln[3:4])

    x_scr[...] = x                                            # carry to next layer

    # ---- last layer: mean over the sequence axis (out.mean(0) in PyTorch layout) ----
    @pl.when(li == num_layers - 1)
    def _finalize():
        o_ref[...] = jnp.mean(x.reshape(b_blk, L, D), axis=1).astype(o_ref.dtype)


# ----------------------------------------------------------------------------
# Parameter handling (PyTorch-style params -> lane-dense stacked kernel layout)
# ----------------------------------------------------------------------------
def init_torch_params(key, d_model, h, d_ff, num_layers):
    """Deterministic params in nn.TransformerEncoderLayer shapes."""
    layers = []
    for li in range(num_layers):
        ks = jax.random.split(jax.random.fold_in(key, li), 8)

        def rn(k, shape, s=0.05):
            return (s * jax.random.normal(k, shape)).astype(jnp.float32)

        layers.append(dict(
            in_proj_w=rn(ks[0], (3 * d_model, d_model)),
            in_proj_b=rn(ks[1], (3 * d_model,)),
            out_proj_w=rn(ks[2], (d_model, d_model)),
            out_proj_b=rn(ks[3], (d_model,)),
            lin1_w=rn(ks[4], (d_ff, d_model)),
            lin1_b=rn(ks[5], (d_ff,)),
            lin2_w=rn(ks[6], (d_model, d_ff)),
            lin2_b=rn(ks[7], (d_model,)),
            ln1_g=jnp.ones((d_model,), jnp.float32),
            ln1_b=jnp.zeros((d_model,), jnp.float32),
            ln2_g=jnp.ones((d_model,), jnp.float32),
            ln2_b=jnp.zeros((d_model,), jnp.float32),
        ))
    return layers


def pack_params(torch_layers, h):
    """Stack per-layer params along a leading layer axis, lane-dense, scale folded."""
    D = torch_layers[0]["in_proj_w"].shape[1]
    dk = D // h
    scale = 1.0 / math.sqrt(dk)
    packed = {k: [] for k in
              ("wqkv", "bqkv", "wo", "bo", "w1", "b1", "w2", "b2", "ln")}
    for tp in torch_layers:
        wq, wk, wv = (tp["in_proj_w"][:D], tp["in_proj_w"][D:2 * D],
                      tp["in_proj_w"][2 * D:])
        bq, bk, bv = (tp["in_proj_b"][:D], tp["in_proj_b"][D:2 * D],
                      tp["in_proj_b"][2 * D:])
        packed["wqkv"].append(jnp.concatenate([wq.T * scale, wk.T, wv.T], axis=1))
        packed["bqkv"].append(jnp.concatenate([bq * scale, bk, bv])[None, :])
        packed["wo"].append(tp["out_proj_w"].T)
        packed["bo"].append(tp["out_proj_b"][None, :])
        packed["w1"].append(tp["lin1_w"].T)
        packed["b1"].append(tp["lin1_b"][None, :])
        packed["w2"].append(tp["lin2_w"].T)
        packed["b2"].append(tp["lin2_b"][None, :])
        packed["ln"].append(jnp.stack(
            [tp["ln1_g"], tp["ln1_b"], tp["ln2_g"], tp["ln2_b"]], axis=0))
    return {k: jnp.stack(v, axis=0).astype(jnp.float32) for k, v in packed.items()}


# ----------------------------------------------------------------------------
# Wrapper
# ----------------------------------------------------------------------------
def positional_encoding(L, D):
    position = jnp.arange(L, dtype=jnp.float32)[:, None]
    div_term = jnp.exp(jnp.arange(0, D, 2, dtype=jnp.float32) *
                       (-math.log(10000.0) / D))
    pe = jnp.zeros((L, D), jnp.float32)
    pe = pe.at[:, 0::2].set(jnp.sin(position * div_term))
    pe = pe.at[:, 1::2].set(jnp.cos(position * div_term))
    return pe


def _vmem_limit_bytes():
    # Generation-aware scoped-VMEM limit: above the 16/32 MiB defaults, with headroom
    # under the 128 MiB (v5e/v6e) / 64 MiB (v7x) physical caps.
    try:
        cap = pltpu.get_tpu_info().vmem_capacity_bytes
        return min(int(cap * 0.8), 100 * 1024 * 1024)
    except Exception:
        return 48 * 1024 * 1024


def transformer_forward(x, packed, h, *, matmul_dtype=jnp.bfloat16,
                        approx_recip=True, batch_block=None):
    """x: (B, d_model, L)  ->  (B, d_model)."""
    B, D, L = x.shape
    assert D % h == 0
    num_layers = packed["wqkv"].shape[0]
    dk = D // h

    # Parallel axis needs >= 2 steps to use v7x's second TensorCore.  At real model
    # sizes pick b_blk so rows = b_blk*L is a multiple of 256 (v6e/v7x) / 128 (v5e).
    b_blk = (max(1, B // 2) if batch_block is None else batch_block)
    if B % b_blk != 0 or (b_blk * L) % 8 != 0:
        b_blk = B                      # full-batch fallback: always sublane-aligned
    rows = b_blk * L

    # Only the layout transpose stays in the wrapper; the PE add is fused in-kernel.
    x2 = jnp.transpose(x, (0, 2, 1)).astype(jnp.float32).reshape(B * L, D)
    pe = positional_encoding(L, D)

    def wcast(a):
        return a.astype(matmul_dtype)  # bf16 weights halve weight DMA / VMEM residency

    ins = [x2, pe,
           wcast(packed["wqkv"]), packed["bqkv"],
           wcast(packed["wo"]), packed["bo"],
           wcast(packed["w1"]), packed["b1"],
           wcast(packed["w2"]), packed["b2"],
           packed["ln"]]

    def layer_spec(a):
        # (num_layers, ...) -> stream one layer's slab per step of the layer grid axis;
        # Pallas double-buffers it (next-layer fetch overlaps current-layer compute).
        trailing = a.shape[1:]
        return pl.BlockSpec(
            (None,) + trailing,
            lambda i, l, _n=len(trailing): (l,) + (0,) * _n)

    in_specs = [
        pl.BlockSpec((rows, D), lambda i, l: (i, 0)),   # activations: one batch block
        pl.BlockSpec((L, D), lambda i, l: (0, 0)),      # PE: tiny, resident
    ] + [layer_spec(a) for a in ins[2:]]

    out = pl.pallas_call(
        functools.partial(transformer_kernel, num_layers, h, dk, b_blk, L,
                          matmul_dtype, approx_recip),
        out_shape=jax.ShapeDtypeStruct((B // b_blk, b_blk, D), jnp.float32),
        grid=(B // b_blk, num_layers),                  # layer axis last, sequential
        in_specs=in_specs,
        out_specs=pl.BlockSpec((None, b_blk, D), lambda i, l: (i, 0, 0)),
        scratch_shapes=[pltpu.VMEM((rows, D), jnp.float32),   # running activation x
                        pltpu.VMEM((rows, D), jnp.float32)],  # per-layer attn output
        compiler_params=pltpu.CompilerParams(
            dimension_semantics=("parallel", "arbitrary"),
            vmem_limit_bytes=_vmem_limit_bytes()),
    )(*ins)
    return out.reshape(B, D)


# ----------------------------------------------------------------------------
# Pure-JAX reference (PyTorch semantics) for a sanity check
# ----------------------------------------------------------------------------
def _ref_forward(x, torch_layers, h):
    B, D, L = x.shape
    dk = D // h
    scale = 1.0 / math.sqrt(dk)
    out = jnp.transpose(x, (0, 2, 1)).astype(jnp.float32) + positional_encoding(L, D)[None]
    for tp in torch_layers:
        qkv = out @ tp["in_proj_w"].T + tp["in_proj_b"]
        q, k, v = jnp.split(qkv, 3, axis=-1)

        def heads(t):
            return t.reshape(B, L, h, dk).transpose(0, 2, 1, 3)

        q, k, v = heads(q) * scale, heads(k), heads(v)
        s = jnp.einsum("bhld,bhmd->bhlm", q, k)
        a = jax.nn.softmax(s, axis=-1)
        o = jnp.einsum("bhlm,bhmd->bhld", a, v)
        o = o.transpose(0, 2, 1, 3).reshape(B, L, D)
        attn = o @ tp["out_proj_w"].T + tp["out_proj_b"]
        out = _layernorm(out + attn, tp["ln1_g"], tp["ln1_b"])
        ff = jnp.maximum(out @ tp["lin1_w"].T + tp["lin1_b"], 0.0)
        ff = ff @ tp["lin2_w"].T + tp["lin2_b"]
        out = _layernorm(out + ff, tp["ln2_g"], tp["ln2_b"])
    return jnp.mean(out, axis=1)                 # mean over the sequence dim


# ----------------------------------------------------------------------------
if __name__ == "__main__":
    B, d_model, L = 2, 32, 16
    h, d_ff, num_layers, dropout = 4, 64, 2, 0.1   # dropout unused at inference

    key = jax.random.PRNGKey(0)
    x = jax.random.normal(jax.random.fold_in(key, 123), (B, d_model, L),
                          dtype=jnp.float32)
    torch_layers = init_torch_params(jax.random.fold_in(key, 7),
                                     d_model, h, d_ff, num_layers)
    packed = pack_params(torch_layers, h)

    ref = jax.block_until_ready(_ref_forward(x, torch_layers, h))

    # Strict path: f32 matmuls + exact reciprocal — validates kernel structure.
    out_f32 = jax.block_until_ready(
        transformer_forward(x, packed, h,
                            matmul_dtype=jnp.float32, approx_recip=False))
    assert out_f32.shape == (B, d_model)
    assert jnp.allclose(out_f32, ref, rtol=1e-4, atol=1e-4), "f32 kernel mismatch"

    # Fast path: bf16 matmul inputs (f32 accumulate) + EUP approx reciprocal.
    out_bf16 = jax.block_until_ready(
        transformer_forward(x, packed, h,
                            matmul_dtype=jnp.bfloat16, approx_recip=True))
    assert out_bf16.shape == (B, d_model)
    assert jnp.allclose(out_bf16, ref, rtol=5e-2, atol=5e-2), "bf16 kernel mismatch"

    print("KERNEL_OK")
</pallas_src>

<mosaic_0001>
module attributes {stable_mosaic.version = 11 : i64} {
  func.func @transformer_kernel(%arg0: i32, %arg1: i32, %arg2: memref<16x32xf32, #tpu.memory_space<vmem>>, %arg3: memref<16x32xf32, #tpu.memory_space<vmem>>, %arg4: memref<1x32x96xf32, #tpu.memory_space<vmem>>, %arg5: memref<1x1x96xf32, #tpu.memory_space<vmem>>, %arg6: memref<1x32x32xf32, #tpu.memory_space<vmem>>, %arg7: memref<1x1x32xf32, #tpu.memory_space<vmem>>, %arg8: memref<1x32x64xf32, #tpu.memory_space<vmem>>, %arg9: memref<1x1x64xf32, #tpu.memory_space<vmem>>, %arg10: memref<1x64x32xf32, #tpu.memory_space<vmem>>, %arg11: memref<1x1x32xf32, #tpu.memory_space<vmem>>, %arg12: memref<1x4x32xf32, #tpu.memory_space<vmem>>, %arg13: memref<1x1x32xf32, #tpu.memory_space<vmem>>, %arg14: memref<16x32xf32, #tpu.memory_space<vmem>>, %arg15: memref<16x32xf32, #tpu.memory_space<vmem>>) attributes {dimension_semantics = [#tpu.dimension_semantics<parallel>, #tpu.dimension_semantics<arbitrary>], iteration_bounds = array<i64: 2, 2>, scalar_prefetch = 0 : i64, scratch_operands = 2 : i64, tpu.core_type = #tpu.core_type<tc>, window_params = [{transform_indices = @transform_0, window_bounds = array<i64: 16, 32>}, {pipeline_mode = #tpu.pipeline_mode<synchronous>, transform_indices = @transform_1, window_bounds = array<i64: 16, 32>}, {transform_indices = @transform_2, window_bounds = array<i64: 1, 32, 96>}, {transform_indices = @transform_3, window_bounds = array<i64: 1, 1, 96>}, {transform_indices = @transform_4, window_bounds = array<i64: 1, 32, 32>}, {transform_indices = @transform_5, window_bounds = array<i64: 1, 1, 32>}, {transform_indices = @transform_6, window_bounds = array<i64: 1, 32, 64>}, {transform_indices = @transform_7, window_bounds = array<i64: 1, 1, 64>}, {transform_indices = @transform_8, window_bounds = array<i64: 1, 64, 32>}, {transform_indices = @transform_9, window_bounds = array<i64: 1, 1, 32>}, {transform_indices = @transform_10, window_bounds = array<i64: 1, 4, 32>}, {transform_indices = @transform_11, window_bounds = array<i64: 1, 1, 32>}]} {
    %c0_i32 = arith.constant 0 : i32
    %0 = arith.cmpi eq, %arg1, %c0_i32 : i32
    %1 = arith.extui %0 : i1 to i32
    %c0_i32_0 = arith.constant 0 : i32
    %2 = arith.cmpi ne, %1, %c0_i32_0 : i32
    scf.if %2 {
      %c0_69 = arith.constant 0 : index
      %c0_70 = arith.constant 0 : index
      %160 = vector.load %arg2[%c0_69, %c0_70] : memref<16x32xf32, #tpu.memory_space<vmem>>, vector<16x32xf32>
      %161 = vector.shape_cast %160 : vector<16x32xf32> to vector<1x16x32xf32>
      %c0_71 = arith.constant 0 : index
      %c0_72 = arith.constant 0 : index
      %162 = vector.load %arg3[%c0_71, %c0_72] : memref<16x32xf32, #tpu.memory_space<vmem>>, vector<16x32xf32>
      %163 = vector.shape_cast %162 : vector<16x32xf32> to vector<1x16x32xf32>
      %164 = arith.addf %161, %163 : vector<1x16x32xf32>
      %165 = vector.shape_cast %164 : vector<1x16x32xf32> to vector<16x32xf32>
      %c0_73 = arith.constant 0 : index
      %c0_74 = arith.constant 0 : index
      %166 = vector.load %arg14[%c0_73, %c0_74] : memref<16x32xf32, #tpu.memory_space<vmem>>, vector<16x32xf32>
      tpu.vector_store %arg14[%c0_73, %c0_74], %165 {strides = array<i32>} : memref<16x32xf32, #tpu.memory_space<vmem>>, vector<16x32xf32>,
    } else {
    }
    %c0 = arith.constant 0 : index
    %c0_1 = arith.constant 0 : index
    %3 = vector.load %arg14[%c0, %c0_1] : memref<16x32xf32, #tpu.memory_space<vmem>>, vector<16x32xf32>
    %c0_2 = arith.constant 0 : index
    %c0_3 = arith.constant 0 : index
    %c0_4 = arith.constant 0 : index
    %4 = vector.load %arg4[%c0_2, %c0_3, %c0_4] : memref<1x32x96xf32, #tpu.memory_space<vmem>>, vector<1x32x96xf32>
    %5 = vector.shape_cast %4 : vector<1x32x96xf32> to vector<32x96xf32>
    %cst = arith.constant dense<0.000000e+00> : vector<16x96xf32>
    %6 = tpu.matmul %3, %5, %cst {dimension_numbers = #tpu.dot_dimension_numbers<[1], [0], [0], [1], [0, 0, 1, 1], [], []>} : vector<16x32xf32>, vector<32x96xf32>, vector<16x96xf32> -> vector<16x96xf32>
    %c0_5 = arith.constant 0 : index
    %c0_6 = arith.constant 0 : index
    %c0_7 = arith.constant 0 : index
    %7 = vector.load %arg5[%c0_5, %c0_6, %c0_7] : memref<1x1x96xf32, #tpu.memory_space<vmem>>, vector<1x1x96xf32>
    %8 = vector.shape_cast %7 : vector<1x1x96xf32> to vector<1x96xf32>
    %9 = vector.broadcast %8 : vector<1x96xf32> to vector<16x96xf32>
    %10 = arith.addf %6, %9 : vector<16x96xf32>
    %11 = vector.shape_cast %10 : vector<16x96xf32> to vector<1x16x96xf32>
    %12 = vector.extract_strided_slice %11 {offsets = [0, 0, 0], sizes = [1, 16, 8], strides = [1, 1, 1]} : vector<1x16x96xf32> to vector<1x16x8xf32>
    %13 = vector.extract_strided_slice %11 {offsets = [0, 0, 32], sizes = [1, 16, 8], strides = [1, 1, 1]} : vector<1x16x96xf32> to vector<1x16x8xf32>
    %14 = vector.extract_strided_slice %11 {offsets = [0, 0, 64], sizes = [1, 16, 8], strides = [1, 1, 1]} : vector<1x16x96xf32> to vector<1x16x8xf32>
    "tpu.trace_start"() <{level = 10 : i32, message = "bqd,bkd->bqk"}> : () -> ()
    %cst_8 = arith.constant dense<0.000000e+00> : vector<1x16x16xf32>
    %15 = tpu.matmul %12, %13, %cst_8 {dimension_numbers = #tpu.dot_dimension_numbers<[2], [2], [1], [1], [0, 0, 0, 1, 1, 1], [0], [0]>} : vector<1x16x8xf32>, vector<1x16x8xf32>, vector<1x16x16xf32> -> vector<1x16x16xf32>
    "tpu.trace_stop"() : () -> ()
    %cst_9 = arith.constant dense<0xFF800000> : vector<1x16xf32>
    %16 = vector.multi_reduction <maximumf>, %15, %cst_9 [2] : vector<1x16x16xf32> to vector<1x16xf32>
    %17 = vector.shape_cast %16 : vector<1x16xf32> to vector<1x16x1xf32>
    %18 = vector.broadcast %17 : vector<1x16x1xf32> to vector<1x16x16xf32>
    %19 = arith.subf %15, %18 : vector<1x16x16xf32>
    %20 = math.exp %19 : vector<1x16x16xf32>
    %cst_10 = arith.constant dense<0.000000e+00> : vector<1x16xf32>
    %21 = vector.multi_reduction <add>, %20, %cst_10 [2] : vector<1x16x16xf32> to vector<1x16xf32>
    %22 = vector.shape_cast %21 : vector<1x16xf32> to vector<1x16x1xf32>
    %23 = tpu.reciprocal %22 : vector<1x16x1xf32> -> vector<1x16x1xf32>
    %24 = vector.broadcast %23 : vector<1x16x1xf32> to vector<1x16x16xf32>
    %25 = arith.mulf %20, %24 : vector<1x16x16xf32>
    "tpu.trace_start"() <{level = 10 : i32, message = "bqk,bkd->bqd"}> : () -> ()
    %cst_11 = arith.constant dense<0.000000e+00> : vector<1x16x8xf32>
    %26 = tpu.matmul %25, %14, %cst_11 {dimension_numbers = #tpu.dot_dimension_numbers<[2], [1], [1], [2], [0, 0, 0, 1, 1, 2], [0], [0]>} : vector<1x16x16xf32>, vector<1x16x8xf32>, vector<1x16x8xf32> -> vector<1x16x8xf32>
    "tpu.trace_stop"() : () -> ()
    %27 = vector.shape_cast %26 : vector<1x16x8xf32> to vector<16x8xf32>
    %c0_12 = arith.constant 0 : index
    %c0_13 = arith.constant 0 : index
    %28 = vector.load %arg15[%c0_12, %c0_13] : memref<16x32xf32, #tpu.memory_space<vmem>>, vector<16x8xf32>
    tpu.vector_store %arg15[%c0_12, %c0_13], %27 {strides = array<i32>} : memref<16x32xf32, #tpu.memory_space<vmem>>, vector<16x8xf32>,
    %29 = vector.extract_strided_slice %11 {offsets = [0, 0, 8], sizes = [1, 16, 8], strides = [1, 1, 1]} : vector<1x16x96xf32> to vector<1x16x8xf32>
    %30 = vector.extract_strided_slice %11 {offsets = [0, 0, 40], sizes = [1, 16, 8], strides = [1, 1, 1]} : vector<1x16x96xf32> to vector<1x16x8xf32>
    %31 = vector.extract_strided_slice %11 {offsets = [0, 0, 72], sizes = [1, 16, 8], strides = [1, 1, 1]} : vector<1x16x96xf32> to vector<1x16x8xf32>
    "tpu.trace_start"() <{level = 10 : i32, message = "bqd,bkd->bqk"}> : () -> ()
    %cst_14 = arith.constant dense<0.000000e+00> : vector<1x16x16xf32>
    %32 = tpu.matmul %29, %30, %cst_14 {dimension_numbers = #tpu.dot_dimension_numbers<[2], [2], [1], [1], [0, 0, 0, 1, 1, 1], [0], [0]>} : vector<1x16x8xf32>, vector<1x16x8xf32>, vector<1x16x16xf32> -> vector<1x16x16xf32>
    "tpu.trace_stop"() : () -> ()
    %cst_15 = arith.constant dense<0xFF800000> : vector<1x16xf32>
    %33 = vector.multi_reduction <maximumf>, %32, %cst_15 [2] : vector<1x16x16xf32> to vector<1x16xf32>
    %34 = vector.shape_cast %33 : vector<1x16xf32> to vector<1x16x1xf32>
    %35 = vector.broadcast %34 : vector<1x16x1xf32> to vector<1x16x16xf32>
    %36 = arith.subf %32, %35 : vector<1x16x16xf32>
    %37 = math.exp %36 : vector<1x16x16xf32>
    %cst_16 = arith.constant dense<0.000000e+00> : vector<1x16xf32>
    %38 = vector.multi_reduction <add>, %37, %cst_16 [2] : vector<1x16x16xf32> to vector<1x16xf32>
    %39 = vector.shape_cast %38 : vector<1x16xf32> to vector<1x16x1xf32>
    %40 = tpu.reciprocal %39 : vector<1x16x1xf32> -> vector<1x16x1xf32>
    %41 = vector.broadcast %40 : vector<1x16x1xf32> to vector<1x16x16xf32>
    %42 = arith.mulf %37, %41 : vector<1x16x16xf32>
    "tpu.trace_start"() <{level = 10 : i32, message = "bqk,bkd->bqd"}> : () -> ()
    %cst_17 = arith.constant dense<0.000000e+00> : vector<1x16x8xf32>
    %43 = tpu.matmul %42, %31, %cst_17 {dimension_numbers = #tpu.dot_dimension_numbers<[2], [1], [1], [2], [0, 0, 0, 1, 1, 2], [0], [0]>} : vector<1x16x16xf32>, vector<1x16x8xf32>, vector<1x16x8xf32> -> vector<1x16x8xf32>
    "tpu.trace_stop"() : () -> ()
    %44 = vector.shape_cast %43 : vector<1x16x8xf32> to vector<16x8xf32>
    %c0_18 = arith.constant 0 : index
    %c8 = arith.constant 8 : index
    %45 = vector.load %arg15[%c0_18, %c8] : memref<16x32xf32, #tpu.memory_space<vmem>>, vector<16x8xf32>
    tpu.vector_store %arg15[%c0_18, %c8], %44 {strides = array<i32>} : memref<16x32xf32, #tpu.memory_space<vmem>>, vector<16x8xf32>,
    %46 = vector.extract_strided_slice %11 {offsets = [0, 0, 16], sizes = [1, 16, 8], strides = [1, 1, 1]} : vector<1x16x96xf32> to vector<1x16x8xf32>
    %47 = vector.extract_strided_slice %11 {offsets = [0, 0, 48], sizes = [1, 16, 8], strides = [1, 1, 1]} : vector<1x16x96xf32> to vector<1x16x8xf32>
    %48 = vector.extract_strided_slice %11 {offsets = [0, 0, 80], sizes = [1, 16, 8], strides = [1, 1, 1]} : vector<1x16x96xf32> to vector<1x16x8xf32>
    "tpu.trace_start"() <{level = 10 : i32, message = "bqd,bkd->bqk"}> : () -> ()
    %cst_19 = arith.constant dense<0.000000e+00> : vector<1x16x16xf32>
    %49 = tpu.matmul %46, %47, %cst_19 {dimension_numbers = #tpu.dot_dimension_numbers<[2], [2], [1], [1], [0, 0, 0, 1, 1, 1], [0], [0]>} : vector<1x16x8xf32>, vector<1x16x8xf32>, vector<1x16x16xf32> -> vector<1x16x16xf32>
    "tpu.trace_stop"() : () -> ()
    %cst_20 = arith.constant dense<0xFF800000> : vector<1x16xf32>
    %50 = vector.multi_reduction <maximumf>, %49, %cst_20 [2] : vector<1x16x16xf32> to vector<1x16xf32>
    %51 = vector.shape_cast %50 : vector<1x16xf32> to vector<1x16x1xf32>
    %52 = vector.broadcast %51 : vector<1x16x1xf32> to vector<1x16x16xf32>
    %53 = arith.subf %49, %52 : vector<1x16x16xf32>
    %54 = math.exp %53 : vector<1x16x16xf32>
    %cst_21 = arith.constant dense<0.000000e+00> : vector<1x16xf32>
    %55 = vector.multi_reduction <add>, %54, %cst_21 [2] : vector<1x16x16xf32> to vector<1x16xf32>
    %56 = vector.shape_cast %55 : vector<1x16xf32> to vector<1x16x1xf32>
    %57 = tpu.reciprocal %56 : vector<1x16x1xf32> -> vector<1x16x1xf32>
    %58 = vector.broadcast %57 : vector<1x16x1xf32> to vector<1x16x16xf32>
    %59 = arith.mulf %54, %58 : vector<1x16x16xf32>
    "tpu.trace_start"() <{level = 10 : i32, message = "bqk,bkd->bqd"}> : () -> ()
    %cst_22 = arith.constant dense<0.000000e+00> : vector<1x16x8xf32>
    %60 = tpu.matmul %59, %48, %cst_22 {dimension_numbers = #tpu.dot_dimension_numbers<[2], [1], [1], [2], [0, 0, 0, 1, 1, 2], [0], [0]>} : vector<1x16x16xf32>, vector<1x16x8xf32>, vector<1x16x8xf32> -> vector<1x16x8xf32>
    "tpu.trace_stop"() : () -> ()
    %61 = vector.shape_cast %60 : vector<1x16x8xf32> to vector<16x8xf32>
    %c0_23 = arith.constant 0 : index
    %c16 = arith.constant 16 : index
    %62 = vector.load %arg15[%c0_23, %c16] : memref<16x32xf32, #tpu.memory_space<vmem>>, vector<16x8xf32>
    tpu.vector_store %arg15[%c0_23, %c16], %61 {strides = array<i32>} : memref<16x32xf32, #tpu.memory_space<vmem>>, vector<16x8xf32>,
    %63 = vector.extract_strided_slice %11 {offsets = [0, 0, 24], sizes = [1, 16, 8], strides = [1, 1, 1]} : vector<1x16x96xf32> to vector<1x16x8xf32>
    %64 = vector.extract_strided_slice %11 {offsets = [0, 0, 56], sizes = [1, 16, 8], strides = [1, 1, 1]} : vector<1x16x96xf32> to vector<1x16x8xf32>
    %65 = vector.extract_strided_slice %11 {offsets = [0, 0, 88], sizes = [1, 16, 8], strides = [1, 1, 1]} : vector<1x16x96xf32> to vector<1x16x8xf32>
    "tpu.trace_start"() <{level = 10 : i32, message = "bqd,bkd->bqk"}> : () -> ()
    %cst_24 = arith.constant dense<0.000000e+00> : vector<1x16x16xf32>
    %66 = tpu.matmul %63, %64, %cst_24 {dimension_numbers = #tpu.dot_dimension_numbers<[2], [2], [1], [1], [0, 0, 0, 1, 1, 1], [0], [0]>} : vector<1x16x8xf32>, vector<1x16x8xf32>, vector<1x16x16xf32> -> vector<1x16x16xf32>
    "tpu.trace_stop"() : () -> ()
    %cst_25 = arith.constant dense<0xFF800000> : vector<1x16xf32>
    %67 = vector.multi_reduction <maximumf>, %66, %cst_25 [2] : vector<1x16x16xf32> to vector<1x16xf32>
    %68 = vector.shape_cast %67 : vector<1x16xf32> to vector<1x16x1xf32>
    %69 = vector.broadcast %68 : vector<1x16x1xf32> to vector<1x16x16xf32>
    %70 = arith.subf %66, %69 : vector<1x16x16xf32>
    %71 = math.exp %70 : vector<1x16x16xf32>
    %cst_26 = arith.constant dense<0.000000e+00> : vector<1x16xf32>
    %72 = vector.multi_reduction <add>, %71, %cst_26 [2] : vector<1x16x16xf32> to vector<1x16xf32>
    %73 = vector.shape_cast %72 : vector<1x16xf32> to vector<1x16x1xf32>
    %74 = tpu.reciprocal %73 : vector<1x16x1xf32> -> vector<1x16x1xf32>
    %75 = vector.broadcast %74 : vector<1x16x1xf32> to vector<1x16x16xf32>
    %76 = arith.mulf %71, %75 : vector<1x16x16xf32>
    "tpu.trace_start"() <{level = 10 : i32, message = "bqk,bkd->bqd"}> : () -> ()
    %cst_27 = arith.constant dense<0.000000e+00> : vector<1x16x8xf32>
    %77 = tpu.matmul %76, %65, %cst_27 {dimension_numbers = #tpu.dot_dimension_numbers<[2], [1], [1], [2], [0, 0, 0, 1, 1, 2], [0], [0]>} : vector<1x16x16xf32>, vector<1x16x8xf32>, vector<1x16x8xf32> -> vector<1x16x8xf32>
    "tpu.trace_stop"() : () -> ()
    %78 = vector.shape_cast %77 : vector<1x16x8xf32> to vector<16x8xf32>
    %c0_28 = arith.constant 0 : index
    %c24 = arith.constant 24 : index
    %79 = vector.load %arg15[%c0_28, %c24] : memref<16x32xf32, #tpu.memory_space<vmem>>, vector<16x8xf32>
    tpu.vector_store %arg15[%c0_28, %c24], %78 {strides = array<i32>} : memref<16x32xf32, #tpu.memory_space<vmem>>, vector<16x8xf32>,
    %c0_29 = arith.constant 0 : index
    %c0_30 = arith.constant 0 : index
    %80 = vector.load %arg15[%c0_29, %c0_30] : memref<16x32xf32, #tpu.memory_space<vmem>>, vector<16x32xf32>
    %c0_31 = arith.constant 0 : index
    %c0_32 = arith.constant 0 : index
    %c0_33 = arith.constant 0 : index
    %81 = vector.load %arg6[%c0_31, %c0_32, %c0_33] : memref<1x32x32xf32, #tpu.memory_space<vmem>>, vector<1x32x32xf32>
    %82 = vector.shape_cast %81 : vector<1x32x32xf32> to vector<32x32xf32>
    %cst_34 = arith.constant dense<0.000000e+00> : vector<16x32xf32>
    %83 = tpu.matmul %80, %82, %cst_34 {dimension_numbers = #tpu.dot_dimension_numbers<[1], [0], [0], [1], [0, 0, 1, 1], [], []>} : vector<16x32xf32>, vector<32x32xf32>, vector<16x32xf32> -> vector<16x32xf32>
    %c0_35 = arith.constant 0 : index
    %c0_36 = arith.constant 0 : index
    %c0_37 = arith.constant 0 : index
    %84 = vector.load %arg7[%c0_35, %c0_36, %c0_37] : memref<1x1x32xf32, #tpu.memory_space<vmem>>, vector<1x1x32xf32>
    %85 = vector.shape_cast %84 : vector<1x1x32xf32> to vector<1x32xf32>
    %86 = vector.broadcast %85 : vector<1x32xf32> to vector<16x32xf32>
    %87 = arith.addf %83, %86 : vector<16x32xf32>
    %c0_38 = arith.constant 0 : index
    %c0_39 = arith.constant 0 : index
    %c0_40 = arith.constant 0 : index
    %88 = vector.load %arg12[%c0_38, %c0_39, %c0_40] : memref<1x4x32xf32, #tpu.memory_space<vmem>>, vector<1x4x32xf32>
    %89 = vector.shape_cast %88 : vector<1x4x32xf32> to vector<4x32xf32>
    %90 = arith.addf %3, %87 : vector<16x32xf32>
    %91 = vector.extract_strided_slice %89 {offsets = [0, 0], sizes = [1, 32], strides = [1, 1]} : vector<4x32xf32> to vector<1x32xf32>
    %92 = vector.extract_strided_slice %89 {offsets = [1, 0], sizes = [1, 32], strides = [1, 1]} : vector<4x32xf32> to vector<1x32xf32>
    %cst_41 = arith.constant dense<0.000000e+00> : vector<16xf32>
    %93 = vector.multi_reduction <add>, %90, %cst_41 [1] : vector<16x32xf32> to vector<16xf32>
    %94 = vector.shape_cast %93 : vector<16xf32> to vector<16x1xf32>
    %cst_42 = arith.constant 3.200000e+01 : f32
    %95 = vector.broadcast %cst_42 : f32 to vector<16x1xf32>
    %96 = arith.divf %94, %95 : vector<16x1xf32>
    %97 = vector.broadcast %96 : vector<16x1xf32> to vector<16x32xf32>
    %98 = arith.subf %90, %97 : vector<16x32xf32>
    %99 = arith.mulf %98, %98 : vector<16x32xf32>
    %cst_43 = arith.constant dense<0.000000e+00> : vector<16xf32>
    %100 = vector.multi_reduction <add>, %99, %cst_43 [1] : vector<16x32xf32> to vector<16xf32>
    %101 = vector.shape_cast %100 : vector<16xf32> to vector<16x1xf32>
    %cst_44 = arith.constant 3.200000e+01 : f32
    %102 = vector.broadcast %cst_44 : f32 to vector<16x1xf32>
    %103 = arith.divf %101, %102 : vector<16x1xf32>
    %104 = vector.broadcast %96 : vector<16x1xf32> to vector<16x32xf32>
    %105 = arith.subf %90, %104 : vector<16x32xf32>
    %cst_45 = arith.constant 9.99999974E-6 : f32
    %106 = vector.broadcast %cst_45 : f32 to vector<16x1xf32>
    %107 = arith.addf %103, %106 : vector<16x1xf32>
    %108 = math.rsqrt %107 : vector<16x1xf32>
    %109 = vector.broadcast %108 : vector<16x1xf32> to vector<16x32xf32>
    %110 = arith.mulf %105, %109 : vector<16x32xf32>
    %111 = vector.broadcast %91 : vector<1x32xf32> to vector<16x32xf32>
    %112 = arith.mulf %110, %111 : vector<16x32xf32>
    %113 = vector.broadcast %92 : vector<1x32xf32> to vector<16x32xf32>
    %114 = arith.addf %112, %113 : vector<16x32xf32>
    %c0_46 = arith.constant 0 : index
    %c0_47 = arith.constant 0 : index
    %c0_48 = arith.constant 0 : index
    %115 = vector.load %arg8[%c0_46, %c0_47, %c0_48] : memref<1x32x64xf32, #tpu.memory_space<vmem>>, vector<1x32x64xf32>
    %116 = vector.shape_cast %115 : vector<1x32x64xf32> to vector<32x64xf32>
    %cst_49 = arith.constant dense<0.000000e+00> : vector<16x64xf32>
    %117 = tpu.matmul %114, %116, %cst_49 {dimension_numbers = #tpu.dot_dimension_numbers<[1], [0], [0], [1], [0, 0, 1, 1], [], []>} : vector<16x32xf32>, vector<32x64xf32>, vector<16x64xf32> -> vector<16x64xf32>
    %c0_50 = arith.constant 0 : index
    %c0_51 = arith.constant 0 : index
    %c0_52 = arith.constant 0 : index
    %118 = vector.load %arg9[%c0_50, %c0_51, %c0_52] : memref<1x1x64xf32, #tpu.memory_space<vmem>>, vector<1x1x64xf32>
    %119 = vector.shape_cast %118 : vector<1x1x64xf32> to vector<1x64xf32>
    %120 = vector.broadcast %119 : vector<1x64xf32> to vector<16x64xf32>
    %121 = arith.addf %117, %120 : vector<16x64xf32>
    %cst_53 = arith.constant 0.000000e+00 : f32
    %122 = vector.broadcast %cst_53 : f32 to vector<16x64xf32>
    %123 = arith.maximumf %121, %122 : vector<16x64xf32>
    %c0_54 = arith.constant 0 : index
    %c0_55 = arith.constant 0 : index
    %c0_56 = arith.constant 0 : index
    %124 = vector.load %arg10[%c0_54, %c0_55, %c0_56] : memref<1x64x32xf32, #tpu.memory_space<vmem>>, vector<1x64x32xf32>
    %125 = vector.shape_cast %124 : vector<1x64x32xf32> to vector<64x32xf32>
    %cst_57 = arith.constant dense<0.000000e+00> : vector<16x32xf32>
    %126 = tpu.matmul %123, %125, %cst_57 {dimension_numbers = #tpu.dot_dimension_numbers<[1], [0], [0], [1], [0, 0, 1, 1], [], []>} : vector<16x64xf32>, vector<64x32xf32>, vector<16x32xf32> -> vector<16x32xf32>
    %c0_58 = arith.constant 0 : index
    %c0_59 = arith.constant 0 : index
    %c0_60 = arith.constant 0 : index
    %127 = vector.load %arg11[%c0_58, %c0_59, %c0_60] : memref<1x1x32xf32, #tpu.memory_space<vmem>>, vector<1x1x32xf32>
    %128 = vector.shape_cast %127 : vector<1x1x32xf32> to vector<1x32xf32>
    %129 = vector.broadcast %128 : vector<1x32xf32> to vector<16x32xf32>
    %130 = arith.addf %126, %129 : vector<16x32xf32>
    %131 = arith.addf %114, %130 : vector<16x32xf32>
    %132 = vector.extract_strided_slice %89 {offsets = [2, 0], sizes = [1, 32], strides = [1, 1]} : vector<4x32xf32> to vector<1x32xf32>
    %133 = vector.extract_strided_slice %89 {offsets = [3, 0], sizes = [1, 32], strides = [1, 1]} : vector<4x32xf32> to vector<1x32xf32>
    %cst_61 = arith.constant dense<0.000000e+00> : vector<16xf32>
    %134 = vector.multi_reduction <add>, %131, %cst_61 [1] : vector<16x32xf32> to vector<16xf32>
    %135 = vector.shape_cast %134 : vector<16xf32> to vector<16x1xf32>
    %cst_62 = arith.constant 3.200000e+01 : f32
    %136 = vector.broadcast %cst_62 : f32 to vector<16x1xf32>
    %137 = arith.divf %135, %136 : vector<16x1xf32>
    %138 = vector.broadcast %137 : vector<16x1xf32> to vector<16x32xf32>
    %139 = arith.subf %131, %138 : vector<16x32xf32>
    %140 = arith.mulf %139, %139 : vector<16x32xf32>
    %cst_63 = arith.constant dense<0.000000e+00> : vector<16xf32>
    %141 = vector.multi_reduction <add>, %140, %cst_63 [1] : vector<16x32xf32> to vector<16xf32>
    %142 = vector.shape_cast %141 : vector<16xf32> to vector<16x1xf32>
    %cst_64 = arith.constant 3.200000e+01 : f32
    %143 = vector.broadcast %cst_64 : f32 to vector<16x1xf32>
    %144 = arith.divf %142, %143 : vector<16x1xf32>
    %145 = vector.broadcast %137 : vector<16x1xf32> to vector<16x32xf32>
    %146 = arith.subf %131, %145 : vector<16x32xf32>
    %cst_65 = arith.constant 9.99999974E-6 : f32
    %147 = vector.broadcast %cst_65 : f32 to vector<16x1xf32>
    %148 = arith.addf %144, %147 : vector<16x1xf32>
    %149 = math.rsqrt %148 : vector<16x1xf32>
    %150 = vector.broadcast %149 : vector<16x1xf32> to vector<16x32xf32>
    %151 = arith.mulf %146, %150 : vector<16x32xf32>
    %152 = vector.broadcast %132 : vector<1x32xf32> to vector<16x32xf32>
    %153 = arith.mulf %151, %152 : vector<16x32xf32>
    %154 = vector.broadcast %133 : vector<1x32xf32> to vector<16x32xf32>
    %155 = arith.addf %153, %154 : vector<16x32xf32>
    %c0_66 = arith.constant 0 : index
    %c0_67 = arith.constant 0 : index
    %156 = vector.load %arg14[%c0_66, %c0_67] : memref<16x32xf32, #tpu.memory_space<vmem>>, vector<16x32xf32>
    tpu.vector_store %arg14[%c0_66, %c0_67], %155 {strides = array<i32>} : memref<16x32xf32, #tpu.memory_space<vmem>>, vector<16x32xf32>,
    %c1_i32 = arith.constant 1 : i32
    %157 = arith.cmpi eq, %arg1, %c1_i32 : i32
    %158 = arith.extui %157 : i1 to i32
    %c0_i32_68 = arith.constant 0 : i32
    %159 = arith.cmpi ne, %158, %c0_i32_68 : i32
    scf.if %159 {
      %160 = vector.shape_cast %155 : vector<16x32xf32> to vector<1x16x32xf32>
      %cst_69 = arith.constant dense<0.000000e+00> : vector<1x32xf32>
      %161 = vector.multi_reduction <add>, %160, %cst_69 [1] : vector<1x16x32xf32> to vector<1x32xf32>
      %cst_70 = arith.constant 1.600000e+01 : f32
      %162 = vector.broadcast %cst_70 : f32 to vector<1x32xf32>
      %163 = arith.divf %161, %162 : vector<1x32xf32>
      %c0_71 = arith.constant 0 : index
      %c0_72 = arith.constant 0 : index
      %c0_73 = arith.constant 0 : index
      %164 = vector.load %arg13[%c0_71, %c0_72, %c0_73] : memref<1x1x32xf32, #tpu.memory_space<vmem>>, vector<1x1x32xf32>
      %165 = vector.shape_cast %164 : vector<1x1x32xf32> to vector<1x32xf32>
      %166 = vector.shape_cast %163 : vector<1x32xf32> to vector<1x1x32xf32>
      tpu.vector_store %arg13[%c0_71, %c0_72, %c0_73], %166 {strides = array<i32>} : memref<1x1x32xf32, #tpu.memory_space<vmem>>, vector<1x1x32xf32>,
    } else {
    }
    return
  }
  func.func @transform_0(%arg0: i32, %arg1: i32) -> (i32, i32) {
    %c0_i32 = arith.constant 0 : i32
    %c0_i32_0 = arith.constant 0 : i32
    return %arg0, %c0_i32 : i32, i32
  }
  func.func @transform_1(%arg0: i32, %arg1: i32) -> (i32, i32) {
    %c0_i32 = arith.constant 0 : i32
    %c0_i32_0 = arith.constant 0 : i32
    %c0_i32_1 = arith.constant 0 : i32
    return %c0_i32, %c0_i32_0 : i32, i32
  }
  func.func @transform_2(%arg0: i32, %arg1: i32) -> (i32, i32, i32) {
    %c0_i32 = arith.constant 0 : i32
    %c0_i32_0 = arith.constant 0 : i32
    %c0_i32_1 = arith.constant 0 : i32
    return %arg1, %c0_i32, %c0_i32_0 : i32, i32, i32
  }
  func.func @transform_3(%arg0: i32, %arg1: i32) -> (i32, i32, i32) {
    %c0_i32 = arith.constant 0 : i32
    %c0_i32_0 = arith.constant 0 : i32
    %c0_i32_1 = arith.constant 0 : i32
    return %arg1, %c0_i32, %c0_i32_0 : i32, i32, i32
  }
  func.func @transform_4(%arg0: i32, %arg1: i32) -> (i32, i32, i32) {
    %c0_i32 = arith.constant 0 : i32
    %c0_i32_0 = arith.constant 0 : i32
    %c0_i32_1 = arith.constant 0 : i32
    return %arg1, %c0_i32, %c0_i32_0 : i32, i32, i32
  }
  func.func @transform_5(%arg0: i32, %arg1: i32) -> (i32, i32, i32) {
    %c0_i32 = arith.constant 0 : i32
    %c0_i32_0 = arith.constant 0 : i32
    %c0_i32_1 = arith.constant 0 : i32
    return %arg1, %c0_i32, %c0_i32_0 : i32, i32, i32
  }
  func.func @transform_6(%arg0: i32, %arg1: i32) -> (i32, i32, i32) {
    %c0_i32 = arith.constant 0 : i32
    %c0_i32_0 = arith.constant 0 : i32
    %c0_i32_1 = arith.constant 0 : i32
    return %arg1, %c0_i32, %c0_i32_0 : i32, i32, i32
  }
  func.func @transform_7(%arg0: i32, %arg1: i32) -> (i32, i32, i32) {
    %c0_i32 = arith.constant 0 : i32
    %c0_i32_0 = arith.constant 0 : i32
    %c0_i32_1 = arith.constant 0 : i32
    return %arg1, %c0_i32, %c0_i32_0 : i32, i32, i32
  }
  func.func @transform_8(%arg0: i32, %arg1: i32) -> (i32, i32, i32) {
    %c0_i32 = arith.constant 0 : i32
    %c0_i32_0 = arith.constant 0 : i32
    %c0_i32_1 = arith.constant 0 : i32
    return %arg1, %c0_i32, %c0_i32_0 : i32, i32, i32
  }
  func.func @transform_9(%arg0: i32, %arg1: i32) -> (i32, i32, i32) {
    %c0_i32 = arith.constant 0 : i32
    %c0_i32_0 = arith.constant 0 : i32
    %c0_i32_1 = arith.constant 0 : i32
    return %arg1, %c0_i32, %c0_i32_0 : i32, i32, i32
  }
  func.func @transform_10(%arg0: i32, %arg1: i32) -> (i32, i32, i32) {
    %c0_i32 = arith.constant 0 : i32
    %c0_i32_0 = arith.constant 0 : i32
    %c0_i32_1 = arith.constant 0 : i32
    return %arg1, %c0_i32, %c0_i32_0 : i32, i32, i32
  }
  func.func @transform_11(%arg0: i32, %arg1: i32) -> (i32, i32, i32) {
    %c0_i32 = arith.constant 0 : i32
    %c0_i32_0 = arith.constant 0 : i32
    %c0_i32_1 = arith.constant 0 : i32
    return %arg0, %c0_i32, %c0_i32_0 : i32, i32, i32
  }
}

</mosaic_0001>

<bundles_post_ra>
// kernel: tpu_custom_call.1
= control target key start
LH: loop header
LB: loop body
LE: loop exit
PB: predicated region body
PF: predicated region fallthrough
CT: control target
= control target key end

     0   :  { %s3392_s0 = inlined_call_operand.hbm [shape: f32[32,32], index: 0, kind: input, shape index: {}]   ;;  %s3393_s1 = inlined_call_operand.hbm [shape: f32[16,32], index: 1, kind: input, shape index: {}]   ;;  %s3394_s2 = inlined_call_operand.vmem [shape: f32[2,32,96], index: 2, kind: input, shape index: {}]   ;;  %s3395_s3 = inlined_call_operand.vmem [shape: f32[2,1,96], index: 3, kind: input, shape index: {}]   ;;  %s3396_s4 = inlined_call_operand.vmem [shape: f32[2,32,32], index: 4, kind: input, shape index: {}]   ;;  %s3397_s5 = inlined_call_operand.hbm [shape: f32[2,1,32], index: 5, kind: input, shape index: {}]   ;;  %s3398_s6 = inlined_call_operand.vmem [shape: f32[2,32,64], index: 6, kind: input, shape index: {}]   ;;  %s3399_s7 = inlined_call_operand.hbm [shape: f32[2,1,64], index: 7, kind: input, shape index: {}]   ;;  %s3400_s8 = inlined_call_operand.vmem [shape: f32[2,64,32], index: 8, kind: input, shape index: {}]   ;;  %s3401_s9 = inlined_call_operand.vmem [shape: f32[2,1,32], index: 9, kind: input, shape index: {}]   ;;  %s3402_s10 = inlined_call_operand.vmem [shape: f32[2,4,32], index: 10, kind: input, shape index: {}]   ;;  %s3403_s11 = inlined_call_operand.hbm [shape: f32[2,1,32], index: 11, kind: output, shape index: {}]  }
   0x1   :  { %3423 = sst [smem:[#allocation29_spill]] %s3392_s0 }
   0x2   :  { %3424 = sst [smem:[#allocation30_spill]] %s3393_s1 }
   0x3   :  { %3425 = sst [smem:[#allocation31_spill]] %s3394_s2 }
   0x4   :  { %3426 = sst [smem:[#allocation32_spill]] %s3396_s4 }
   0x5   :  { %3427 = sst [smem:[#allocation33_spill]] %s3397_s5 }
   0x6   :  { %3428 = sst [smem:[#allocation34_spill]] %s3399_s7 }
   0x7   :  { %3429 = sst [smem:[#allocation35_spill]] %s3400_s8 }
   0x8   :  { %3430 = sst [smem:[#allocation36_spill]] %s3401_s9 }
   0x9   :  { %3431 = sst [smem:[#allocation37_spill]] %s3402_s10 }
   0xa   :  { %3432 = sst [smem:[#allocation38_spill]] %s3403_s11 }
   0xb   :  { %16 = vsyncpa [#allocation5], 0 }
   0xc   :  { %18 = vsyncpa [#allocation5 + $0x1], 0 }
   0xd   :  { %19 = vsyncpa [#allocation8], 0 }
   0xe   :  { %20 = vsyncpa [#allocation6], 0 }
   0xf   :  { %22 = vsyncpa [#allocation6 + $0x1], 0  ;;  %s2896_s17 = smov 0   ;;  %s2898_s18 = smov 0  }
  0x10   :  { %s2900_s19 = smov 0   ;;  %s2902_s20 = smov 0  }
  0x11   :  { %s2904_s21 = smov 0   ;;  %s2906_s22 = smov 0  }
  0x12   :  { %s2908_s23 = smov 0   ;;  %s2910_s24 = smov 0  }
  0x13   :  { %s2912_s25 = smov 0   ;;  %s2914_s26 = smov 0  }
  0x14   :  { %s2916_s27 = smov 0  }
  0x15 LB: > { %3433 = sst [smem:[#allocation16_spill]] %s2777_s18  ;;  %p54_p0 = scmp.ne.s32.totalorder %s2793_s22, %s2789_s21  ;;  %s2813_s27 = sphi %s2916_s27, %s28_s27   ;;  %s2809_s26 = sphi %s2914_s26, %s3491_s26   ;;  %s2805_s25 = sphi %s2912_s25, %s3490_s25   ;;  %s2801_s24 = sphi %s2910_s24, %s3489_s24   ;;  %s2797_s23 = sphi %s2908_s23, %s3488_s23   ;;  %s2793_s22 = sphi %s2906_s22, %s3487_s22   ;;  %s2789_s21 = sphi %s2904_s21, %s3486_s21   ;;  %s2785_s20 = sphi %s2902_s20, %s3485_s20   ;;  %s2781_s19 = sphi %s2900_s19, %s3484_s19   ;;  %s2777_s18 = sphi %s2898_s18, %s3483_s18   ;;  %s2773_s17 = sphi %s2896_s17, %s3482_s17  }
  0x16   : > { %3434 = sst [smem:[#allocation17_spill]] %s2781_s19  ;;  %p55_p1 = scmp.eq.s32.totalorder %s2813_s27, 0 }
  0x17   : > { %3435 = sst [smem:[#allocation18_spill]] %s2785_s20  ;;  %p2427_p3 = scmp.lt.s32.totalorder %s2813_s27, 4 }
  0x18   : > { %3436 = sst [smem:[#allocation19_spill]] %s2789_s21  ;;  %p56_p2 = por %p55_p1, %p54_p0 }
  0x19   : > { %3437 = sst [smem:[#allocation20_spill]] %s2793_s22  ;;  %s378_s30 = sand.u32 1, %s2813_s27  }
  0x1a   : > { %3438 = sst [smem:[#allocation21_spill]] %s2801_s24  ;;  %s380_s12 = sand.u32 1, %s2793_s22  }
  0x1b   : > { %3439 = sst [smem:[#allocation22_spill]] %s2805_s25  ;;  %s2165_s13 = sshll.u32 %s380_s12, 4 }
  0x1c   : > { %3440 = sst [smem:[#allocation23_spill]] %s2809_s26  ;;  %s2223_s14 = sshll.u32 %s2809_s26, 8 }
  0x1d   : > { %s3441_s0 = sld [smem:[#allocation29_spill]]  ;;  %s382_s24 = scalar_lea.vmem [#allocation4], %s2165_s13 }
  0x1e   : > { %s389_s10 = sshll.u32 %s382_s24, 4  ;;  %p2970_p4 = pnand %p2427_p3, %p56_p2  ;;  %s390_s10 = int_to_ptr.vmem [resolvable:$true] %s389_s10 }
  0x1f   : > { %s2974_s29 = scalar_lea.sflag [#allocation5], %s378_s30  ;;  %s2588_s9 = scalar_lea.vmem %s390_s10, 256 }
  0x20   : > { %p2577_p5 = pneg %p2970_p4  ;;  %p2589_p6 = scmp.ne.s32.totalorder %s390_s10, %s2588_s9 }
  0x21   : > { %s2815_s12 = smov [#allocation4]  }
  0x22   : > { %p2591_p7 = pnand %p2589_p6, %p2577_p5  ;;  %s2593_s15 = sshll.u32 %s2815_s12, 4  ;;  %s2594_s15 = int_to_ptr.vmem [resolvable:$false] %s2593_s15 }
  0x23   : > { %s388_s11 = scalar_lea.hbm %s3441_s0, %s2223_s14  ;;  %s2595_s13 = scalar_lea.vmem %s2594_s15, 512 }
  0x24   : > { %p2592_p8 = pneg %p2591_p7  ;;  %p2596_p9 = scmp.lt.s32.totalorder %s390_s10, %s2594_s15 }
  0x25   : > { %p2597_p10 = scmp.lt.s32.totalorder %s2595_s13, %s2588_s9 }
  0x27   : > { %p2598_p11 = por %p2597_p10, %p2596_p9 }
  0x29   : > { %p2599_p12 = pnand %p2598_p11, %p2592_p8 }
  0x2b   : > { %2602 = shalt.err (!%p2599_p12)
}
  0x2c   : > { %s3405_s24 = smov 128   ;;  %s3406_s30 = smov 8  }
  0x2d   : > { %2415 = dma.hbm_to_vmem [thread:$0]  (!%p2970_p4), %s388_s11, 256, %s390_s10, %s2974_s29, %s3405_s24, %s3405_s24, %s3406_s30  }
  0x2e   : > { %s37_s9 = sadd.s32 1, %s2805_s25  ;;  %s172_s14 = sadd.s32 1, %s2781_s19 }
  0x2f   : > { %p38_p13 = scmp.ge.s32.totalorder %s37_s9, 2  ;;  %p179_p2 = scmp.ne.s32.totalorder %s2781_s19, %s2777_s18 }
  0x30   : > { %p185_p5 = scmp.ne.s32.totalorder %s2777_s18, %s2773_s17  ;;  %s3410_s16 = sand.u32 1, %s2781_s19  }
  0x31   : > { %s3493_s9 = smov (%p38_p13, %s37_s9), 0  ;;  %s3444_s12 = sadd.s32 1, %s2809_s26 }
  0x32   : > { %3443 = sst [smem:[#allocation24_spill]] %s3493_s9  ;;  %s3495_s12 = smov (!%p38_p13, %s3444_s12), %s2809_s26 }
  0x33   : > { %s169_s28 = ssub.s32 %s2805_s25, %s3493_s9  ;;  %p181_p4 = por %p179_p2, %p55_p1 }
  0x34   : > { %p42_p6 = scmp.ge.s32.totalorder %s3495_s12, 2  ;;  %p170_p7 = scmp.eq.s32.totalorder %s169_s28, 0 }
  0x35   : > { %s2168_s10 = sshll.u32 %s2805_s25, 4  ;;  %s3447_s5 = sld [smem:[#allocation33_spill]] }
  0x36   : > { %s3497_s12 = smov (%p42_p6, %s3495_s12), 0  ;;  %s424_s0 = scalar_lea.vmem [#allocation9], %s3410_s16 }
  0x37   : > { %3445 = sst [smem:[#allocation25_spill]] %s3497_s12  ;;  %s44_s15 = ssub.s32 %s2809_s26, %s3497_s12 }
  0x38   : > { %s3004_s11 = scalar_select %p170_p7, %s2781_s19, %s172_s14  }
  0x39   : > { %p45_p8 = scmp.eq.s32.totalorder %s44_s15, 0  ;;  %s431_s9 = sshll.u32 %s424_s0, 4  ;;  %s432_s9 = int_to_ptr.vmem [resolvable:$true] %s431_s9 }
  0x3a   : > { %3446 = sst [smem:[#allocation26_spill]] %s3004_s11  ;;  %p3017_p1 = pnand %p2427_p3, %p181_p4 }
  0x3b   : > { %s429_s30 = scalar_lea.hbm %s3447_s5, %s2168_s10  ;;  %s3449_s8 = sadd.s32 1, %s2793_s22 }
  0x3c   : > { %s3024_s14 = scalar_select %p45_p8, %s2793_s22, %s3449_s8  }
  0x3d   : > { %p3409_p9 = pneg %p3017_p1  ;;  %s2616_s12 = scalar_lea.vmem %s432_s9, 16 }
  0x3e   : > { %3450 = sst [smem:[#allocation27_spill]] %s3024_s14  ;;  %p2617_p10 = scmp.ne.s32.totalorder %s432_s9, %s2616_s12 }
  0x3f   : > { %s2818_s0 = smov [#allocation9]  }
  0x40   : > { %p2619_p11 = pnand %p2617_p10, %p3409_p9  ;;  %s2621_s24 = sshll.u32 %s2818_s0, 4  ;;  %s2622_s24 = int_to_ptr.vmem [resolvable:$false] %s2621_s24 }
  0x41   : > { %s2623_s15 = scalar_lea.vmem %s2622_s24, 32  ;;  %p2624_p3 = scmp.lt.s32.totalorder %s432_s9, %s2622_s24 }
  0x42   : > { %p2620_p12 = pneg %p2619_p11  ;;  %p2625_p13 = scmp.lt.s32.totalorder %s2623_s15, %s2616_s12 }
  0x44   : > { %p2626_p2 = por %p2625_p13, %p2624_p3 }
  0x46   : > { %p2627_p4 = pnand %p2626_p2, %p2620_p12 }
  0x48   : > { %2630 = shalt.err (!%p2627_p4)
}
  0x49   : > { %2418 = dma.hbm_to_vmem [thread:$0]  (!%p3017_p1), %s429_s30, 16, %s432_s9, %s2974_s29  }
  0x4a   : > { %s3035_s8 = sadd.s32 4294967295, %s2813_s27   ;;  %s2161_s12 = sadd.s32 4294967294, %s2813_s27  }
  0x4b   : > { %p60_p6 = scmp.ne.s32.totalorder %s2789_s21, %s2785_s20  ;;  %p3416_p7 = scmp.eq.s32.totalorder %s3035_s8, 0 }
  0x4c   : > { %p339_p8 = scmp.eq.s32.totalorder %s3035_s8, 3  ;;  %p345_p10 = scmp.eq.s32.totalorder %s2161_s12, 3 }
  0x4d   : > { %p2162_p11 = scmp.ge.s32.totalorder %s2813_s27, 1  ;;  %p3045_p12 = por %p3416_p7, %p60_p6 }
  0x4e   : > { %p3054_p3 = por %p185_p5, %p3416_p7  ;;  %p3061_p13 = por %p339_p8, %p54_p0 }
  0x4f   : > { %s3451_s13 = scalar_select %p3045_p12, 1, 0 }
  0x50   : > { %s3452_s30 = scalar_select %p3054_p3, 1, 0 }
  0x51   : > { %s3453_s9 = scalar_select %p3061_p13, 1, 0 }
  0x52   : > { %p3065_p2 = por %p345_p10, %p60_p6  ;;  %p352_p4 = scmp.lt.s32.totalorder %s2813_s27, 5 }
  0x53   : > { %s2819_s17 = smov [#allocation7]   ;;  %s3457_s7 = sld [smem:[#allocation34_spill]] }
  0x54   : > { %s3454_s0 = scalar_select %p3065_p2, 1, 0 }
  0x55   : > { %p3070_p9 = pnand %p2162_p11, %p352_p4  ;;  %s364_s15 = sshll.u32 %s2819_s17, 4  ;;  %s3083_s15 = int_to_ptr.vmem [resolvable:$true] %s364_s15 }
  0x56   : > { %3455 = sst [smem:[#allocation28_spill]] %s3454_s0  ;;  %s3458_s26 = sand.u32 1, %s2781_s19  }
  0x57   : > { %p2408_p0 = pneg %p3070_p9  ;;  %s449_s14 = scalar_lea.vmem [#allocation10], %s3458_s26 }
  0x58   : > { %s456_s22 = sshll.u32 %s449_s14, 4  ;;  %p3460_p8 = pneg %p3017_p1  ;;  %s457_s22 = int_to_ptr.vmem [resolvable:$true] %s456_s22 }
  0x59   : > { %s454_s5 = scalar_lea.hbm %s3457_s7, %s2168_s10  ;;  %p3087_p5 = pnand %p2408_p0, %p3416_p7 }
  0x5a   : > { %s2644_s0 = scalar_lea.vmem %s457_s22, 16  ;;  %s2820_s16 = smov [#allocation10]  }
  0x5b   : > { %p2645_p6 = scmp.ne.s32.totalorder %s457_s22, %s2644_s0  ;;  %s2649_s10 = sshll.u32 %s2820_s16, 4  ;;  %s2650_s10 = int_to_ptr.vmem [resolvable:$false] %s2649_s10 }
  0x5c   : > { %s2651_s17 = scalar_lea.vmem %s2650_s10, 32  ;;  %p2652_p4 = scmp.lt.s32.totalorder %s457_s22, %s2650_s10 }
  0x5d   : > { %p2647_p10 = pnand %p2645_p6, %p3460_p8  ;;  %p2653_p2 = scmp.lt.s32.totalorder %s2651_s17, %s2644_s0 }
  0x5f   : > { %p2648_p11 = pneg %p2647_p10  ;;  %p2654_p13 = por %p2653_p2, %p2652_p4 }
  0x61   : > { %p2655_p3 = pnand %p2654_p13, %p2648_p11 }
  0x63   : > { %2658 = shalt.err (!%p2655_p3)
}
  0x64   : > { %2421 = dma.hbm_to_vmem [thread:$0]  (!%p3017_p1), %s454_s5, 16, %s457_s22, %s2974_s29  }
  0x65   : > { %p2661_p0 = pneg %p3087_p5  ;;  %s2670_s26 = scalar_lea.vmem %s3083_s15, 256 }
  0x66   : > { %p2671_p6 = scmp.ne.s32.totalorder %s3083_s15, %s2670_s26  ;;  %p2678_p7 = scmp.lt.s32.totalorder %s3083_s15, %s3083_s15 }
  0x67   : > { %p2679_p12 = scmp.lt.s32.totalorder %s2670_s26, %s2670_s26 }
  0x68   : > { %p2673_p8 = pnand %p2671_p6, %p2661_p0 }
  0x69   : > { %p2680_p2 = por %p2679_p12, %p2678_p7 }
  0x6a   : > { %p2674_p10 = pneg %p2673_p8 }
  0x6c   : > { %p2681_p13 = pnand %p2680_p2, %p2674_p10 }
  0x6e   : > { %2684 = shalt.err (!%p2681_p13)
}
  0x6f   : > { %s3461_s28 = smov 8   ;;  %s3462_s14 = smov 128  }
  0x70   : > { %s3463_s1 = sld [smem:[#allocation30_spill]]  ;;  %s488_s22 = sand.u32 (!%p3070_p9), 1, %s3035_s8  }
  0x71   : > { %s3116_s29 = sand.u32 (!%p3070_p9), 1, %s2789_s21   ;;  %s489_s11 = scalar_lea.sflag (!%p3070_p9), [#allocation5], %s488_s22 }
  0x72   : > { %486 = sbr.rel (%p3070_p9) target bundleno = 3651 (0xe43), region = 64  ;;  %s2171_s12 = sshll.u32 (!%p3070_p9), %s3116_s29, 4 }
  0x73   : > { %s492_s16 = scalar_lea.vmem (!%p3070_p9), [#allocation4], %s2171_s12  ;;  %p3464_p1 = scmp.ne.s32.totalorder (!%p3070_p9), %s3451_s13, 0 }
  0x76   : > { %2411 = dma.hbm_to_vmem [thread:$0]  (!%p3087_p5), %s3463_s1, 256, %s3083_s15, [#allocation8], %s3462_s14, %s3462_s14, %s3461_s28  }
  0x77   : > { %2756 = dma.done.wait (%p3464_p1), %s489_s11, 256  }
  0x78   : > { %2758 = vsyncadd (%p3464_p1), %s489_s11, 4294967040  ;;  %p3465_p7 = scmp.eq.s32.totalorder %s3035_s8, 0 }
  0x7a   : > { %2760 = dma.done.wait (%p3465_p7), [#allocation8], 256   ;;  %p3466_p9 = pmov %p3465_p7 }
  0x7b   : > { %s503_s24 = sand.u32 1, %s2777_s18   ;;  %p3467_p12 = scmp.ne.s32.totalorder %s3452_s30, 0 }
  0x7c   : > { %2762 = vsyncadd (%p3466_p9), [#allocation8], 4294967040  ;;  %s3128_s15 = scalar_lea.vmem [#allocation9], %s503_s24 }
  0x7d   : > { %2764 = dma.done.wait (%p3467_p12), %s489_s11, 32  }
  0x7e   : > { %2766 = vsyncadd (%p3467_p12), %s489_s11, 4294967264  ;;  %p589_p3 = scmp.lt.s32.totalorder %s2797_s23, 1  ;;  %s3468_s2 = sld [smem:[#allocation31_spill]] }
  0x7f   : > { %s3469_s4 = sld [smem:[#allocation32_spill]]  ;;  %s3174_s20 = scalar_lea.vmem [#allocation10], %s503_s24 }
  0x80   : > { %s3136_s13 = scalar_select %p589_p3, %s2797_s23, 1 }
  0x81   : > { %s3470_s10 = sld [smem:[#allocation35_spill]]  ;;  %p2182_p5 = scmp.ne.s32.totalorder %s2797_s23, 0 }
  0x82   : > { %s2224_s8 = sshll.u32 %s3136_s13, 5  ;;  %s2227_s7 = sshll.u32 %s3136_s13, 6 }
  0x83   : > { %s3156_s1 = scalar_lea.vmem %s3398_s6, %s2224_s8  ;;  %s3471_s14 = sld [smem:[#allocation36_spill]] }
  0x84   : > { %s3146_s30 = scalar_lea.vmem %s3468_s2, %s2224_s8  ;;  %s2181_s19 = sshll.u32 %s3136_s13, 2 }
  0x85   : > { %s3151_s22 = scalar_lea.vmem %s3469_s4, %s2224_s8  ;;  %s3472_s5 = sld [smem:[#allocation37_spill]] }
  0x86   : > { %s587_s8 = scalar_lea.vmem [#allocation11], %s3116_s29 }
  0x87   : > { %s3162_s17 = scalar_lea.vmem %s3470_s10, %s2227_s7  ;;  %622 = sbr.rel (%p2182_p5) target bundleno = 145 (0x91), region = 84 }
  0x89   : > { %s614_s2 = scalar_lea.vmem %s3471_s14, %s3136_s13 }
  0x8b   : > { %s3172_s4 = scalar_lea.vmem %s3472_s5, %s2181_s19 }
  0x8c   : > { %v623_v0 = vld [vmem:[%s492_s16] sm:$0xff]  ;;  %vm629_vm0 = vcmask 261120   ;;  %v624_v2 = vld [vmem:[%s492_s16 + $0x8] sm:$0xff] }
  0x8d   : > { %v625_v1 = vld [vmem:[#allocation7] sm:$0xff]  ;;  %v626_v4 = vld [vmem:[#allocation7 + $0x8] sm:$0xff] }
  0x8e   : > { %v627_v3 = vadd.f32 %v625_v1, %v623_v0  ;;  %v628_v5 = vadd.f32 %v626_v4, %v624_v2 }
  0x90   : > { %630 = vst.msk [vmem:[#allocation2] sm:$0xff] %vm629_vm0, %v627_v3  ;;  %631 = vst.msk [vmem:[#allocation2 + $0x8] sm:$0xff] %vm629_vm0, %v628_v5 }
  0x91 PF: > { %v637_v6 = vld [vmem:[%s3146_s30 + $0x18] sm:$0xff]  ;;  %v636_v7 = vld [vmem:[%s3146_s30 + $0x10] sm:$0xff]  ;;  %vm645_vm1 = vcmask 261120   ;;  %v635_v9 = vld [vmem:[%s3146_s30 + $0x8] sm:$0xff]  ;;  %s3473_s19 = scalar_lea.vmem %s3395_s3, %s3136_s13  ;;  %vm733_vm2 = vcmask 64512   ;;  %s2821_s21 = smov 88  }
  0x92   : > { %2288 = vmatprep.subr.mxu1 %v637_v6  ;;  %v634_v10 = vld [vmem:[%s3146_s30] sm:$0xff]  ;;  %s2822_s25 = smov 96   ;;  %s2823_s16 = smov 120   ;;  %vm817_vm3 = vcmask 130048   ;;  %vm1137_vm4 = vcmask 130112   ;;  %vm1348_vm5 = vcmask 195712  }
  0x93   : > { %2289 = vmatpush3.msra.mxu1 %v637_v6  ;;  %v2183_v12 = vld [vmem:[%s3473_s19] ss:$0 sm:$0xff]  ;;  %s2824_s24 = smov 64   ;;  %s2825_s26 = smov 56   ;;  %vm1559_vm6 = vcmask 261312   ;;  %vm1807_vm7 = vcmask 523264  }
  0x94   : > { %2290 = vmatprep.subr.mxu1 %v636_v7  ;;  %s2826_s30 = smov 80   ;;  %s2827_s12 = smov 112  }
  0x95   : > { %2291 = vmatpush3.msra.mxu1 %v636_v7  ;;  %s2828_s11 = smov 48   ;;  %s2829_s10 = smov 72  }
  0x96   : > { %2292 = vmatprep.subr.mxu1 %v635_v9  ;;  %s2830_s28 = smov 104   ;;  %s2831_s14 = smov 40  }
  0x97   : > { %v3180_v8 = vld [vmem:[#allocation2] sm:$0xff]  ;;  %2293 = vmatpush3.msra.mxu1 %v635_v9  ;;  %v3186_v11 = vld [vmem:[#allocation2 + $0x8] sm:$0xff]  ;;  %s2832_s0 = smov 8   ;;  %s2833_s5 = smov 16  }
  0x98   : > { %2296 = vmatprep.mubr.msk.f32.mxu1 %vm645_vm1, %v3180_v8  ;;  %2294 = vmatprep.subr.mxu1 %v634_v10  ;;  %s2834_s7 = smov 24   ;;  %p2219_p11 = scmp.ne.s32.totalorder %s2797_s23, 1 }
  0x99   : > { %2295 = vmatpush3.msra.mxu1 %v634_v10 }
  0x9a   : > { %2297 = vmatmul.mubr.msk.f32.vlgmr.msra.gmra.mxu1 %vm645_vm1, %v3186_v11 }
 0x15a   : > { %v2298_v13 = vpop.f32.mrf.mxu1 }
 0x15b   : > { %v3195_v14 = vadd.f32 %v2298_v13, %v2183_v12 }
 0x15c   : > { %v718_v15 = vpop.f32.mrf.mxu1 }
 0x15d   : > { %v3197_v16 = vadd.f32 %v2183_v12, %v718_v15  ;;  %935 = vrot.lane.b32.xlu1 %v3195_v14, %s2821_s21  ;;  %731 = vrot.lane.b32.xlu0 %v3195_v14, %s2822_s25 }
 0x15f   : > { %2303 = vmatprep.mubr.msk.f32.mxu1 %vm733_vm2, %v3197_v16 }
 0x161   : > { %933 = vrot.lane.b32.xlu1 %v3197_v16, %s2821_s21  ;;  %729 = vrot.lane.b32.xlu0 %v3197_v16, %s2822_s25 }
 0x165   : > { %931 = vrot.lane.b32.xlu1 %v3195_v14, %s2823_s16  ;;  %929 = vrot.lane.b32.xlu0 %v3197_v16, %s2823_s16 }
 0x1cf   : > { %v732_v17 = vpop.permute.xlu0 %731  ;;  %v936_v18 = vpop.permute.xlu1 %935 }
 0x1d0   : > { %2299 = vmatprep.subr.msk.mxu1 %vm733_vm2, %v732_v17 }
 0x1d1   : > { %2300 = vmatpush3.xpose.msk.msra.mxu1 %vm733_vm2, %v732_v17 }
 0x1d3   : > { %v730_v19 = vpop.permute.xlu0 %729  ;;  %v934_v21 = vpop.permute.xlu1 %933 }
 0x1d4   : > { %2301 = vmatprep.subr.msk.mxu1 %vm733_vm2, %v730_v19 }
 0x1d5   : > { %2302 = vmatpush3.xpose.msk.msra.mxu1 %vm733_vm2, %v730_v19 }
 0x1d6   : > { %2313 = vmatprep.subr.msk.mxu1 %vm733_vm2, %v936_v18 }
 0x1d7   : > { %v930_v20 = vpop.permute.xlu0 %929  ;;  %v932_v22 = vpop.permute.xlu1 %931 }
 0x1d8   : > { %2304 = vmatmul.mubr.msk.f32.vlgmr.msra.gmra.mxu1 %vm733_vm2, %v3195_v14 }
 0x1d9   : > { %2314 = vmatpush3.xpose.msk.msra.mxu1 %vm733_vm2, %v936_v18  ;;  %2317 = vmatprep.mubr.msk.f32.mxu1 %vm733_vm2, %v930_v20 }
 0x1da   : > { %2315 = vmatprep.subr.msk.mxu1 %vm733_vm2, %v934_v21 }
 0x1dd   : > { %2316 = vmatpush3.xpose.msk.msra.mxu1 %vm733_vm2, %v934_v21 }
 0x1e0   : > { %2318 = vmatmul.mubr.msk.f32.vlgmr.msra.gmra.mxu1 %vm733_vm2, %v932_v22 }
 0x298   : > { %v2305_v23 = vpop.f32.mrf.mxu1 }
 0x299   : > { %v821_v24 = vsel %vm817_vm3, %v2305_v23, -inf }
 0x29a   : > { %822 = vmax.xlane.f32.xlu1 %v821_v24  ;;  %v808_v25 = vpop.f32.mrf.mxu1 }
 0x29b   : > { %v818_v26 = vsel %vm817_vm3, %v808_v25, -inf }
 0x29c   : > { %819 = vmax.xlane.f32.xlu0 %v818_v26 }
 0x2a0   : > { %v2319_v27 = vpop.f32.mrf.mxu1 }
 0x2a1   : > { %v1023_v30 = vsel %vm817_vm3, %v2319_v27, -inf }
 0x2a2   : > { %v1011_v28 = vpop.f32.mrf.mxu1 }
 0x2a3   : > { %v1020_v29 = vsel %vm817_vm3, %v1011_v28, -inf }
 0x2a4   : > { %1021 = vmax.xlane.f32.xlu0 %v1020_v29 }
 0x2a8   : > { %1024 = vmax.xlane.f32.xlu0 %v1023_v30 }
 0x2ab   : > { %842 = vrot.lane.b32.xlu1 %v3195_v14, %s2824_s24 }
 0x2af   : > { %1044 = vrot.lane.b32.xlu1 %v3195_v14, %s2825_s26 }
 0x2b3   : > { %1042 = vrot.lane.b32.xlu1 %v3197_v16, %s2825_s26 }
 0x2be   : > { %840 = vrot.lane.b32.xlu0 %v3197_v16, %s2824_s24 }
 0x323   : > { %v823_v31 = vpop.xlane.xlu1 %822 }
 0x324   : > { %v825_v32 = vsub.f32 %v2305_v23, %v823_v31 }
 0x325   : > { %v820_v33 = vpop.xlane.xlu0 %819 }
 0x326   : > { %v828_v34 = vmul.f32 1.442695, %v825_v32  ;;  %v824_v35 = vsub.f32 %v808_v25, %v820_v33 }
 0x327   : > { %v843_v36 = vpop.permute.xlu1 %842 }
 0x328   : > { %2535 = vpow2.f32 %v828_v34  ;;  %v826_v37 = vmul.f32 1.442695, %v824_v35  ;;  %2306 = vmatprep.subr.mxu0 %v843_v36 }
 0x329   : > { %2307 = vmatpush3.msra.mxu0 %v843_v36 }
 0x32a   : > { %2537 = vpow2.f32 %v826_v37 }
 0x32b   : > { %v1045_v46 = vpop.permute.xlu1 %1044 }
 0x32d   : > { %v1022_v38 = vpop.xlane.xlu0 %1021 }
 0x32e   : > { %v1026_v50 = vsub.f32 %v1011_v28, %v1022_v38 }
 0x32f   : > { %v1043_v54 = vpop.permute.xlu1 %1042 }
 0x330   : > { %v1028_v51 = vmul.f32 1.442695, %v1026_v50 }
 0x331   : > { %v1025_v39 = vpop.xlane.xlu0 %1024 }
 0x332   : > { %v1027_v40 = vsub.f32 %v2319_v27, %v1025_v39 }
 0x334   : > { %v1030_v41 = vmul.f32 1.442695, %v1027_v40 }
 0x335   : > { %v2536_v42 = vpop.eup %2535  ;;  %v841_v43 = vpop.permute.xlu0 %840 }
 0x336   : > { %2539 = vpow2.f32 %v1030_v41  ;;  %2308 = vmatprep.subr.mxu0 %v841_v43  ;;  %v833_v44 = vsel %vm817_vm3, %v2536_v42, 0.0 }
 0x337   : > { %v2538_v45 = vpop.eup %2537  ;;  %834 = vadd.xlane.f32.xlu0 %v833_v44  ;;  %2309 = vmatpush3.msra.mxu0 %v841_v43  ;;  %2541 = vpow2.f32 %v1028_v51 }
 0x338   : > { %2320 = vmatprep.subr.mxu0 %v1045_v46  ;;  %v830_v47 = vsel %vm817_vm3, %v2538_v45, 0.0 }
 0x339   : > { %831 = vadd.xlane.f32.xlu1 %v830_v47 }
 0x343   : > { %v2540_v48 = vpop.eup %2539 }
 0x344   : > { %v1035_v49 = vsel %vm817_vm3, %v2540_v48, 0.0  ;;  %v2542_v52 = vpop.eup %2541 }
 0x345   : > { %1036 = vadd.xlane.f32.xlu0 %v1035_v49  ;;  %v1032_v53 = vsel %vm817_vm3, %v2542_v52, 0.0 }
 0x34a   : > { %1144 = vrot.lane.b32.xlu1 %v3197_v16, %s2826_s30 }
 0x35b   : > { %1146 = vrot.lane.b32.xlu0 %v3195_v14, %s2826_s30 }
 0x35f   : > { %1140 = vrot.lane.b32.xlu0 %v3197_v16, %s2827_s12 }
 0x36e   : > { %1033 = vadd.xlane.f32.xlu1 %v1032_v53 }
 0x37f   : > { %1142 = vrot.lane.b32.xlu1 %v3195_v14, %s2827_s12 }
 0x3c0   : > { %v835_v55 = vpop.xlane.xlu0 %834 }
 0x3c1   : > { %2543 = vrcp.f32 %v835_v55 }
 0x3c2   : > { %v832_v56 = vpop.xlane.xlu1 %831 }
 0x3c3   : > { %2545 = vrcp.f32 %v832_v56 }
 0x3c6   : > { %v1145_v63 = vpop.permute.xlu1 %1144 }
 0x3ce   : > { %v2544_v57 = vpop.eup %2543  ;;  %v1037_v59 = vpop.xlane.xlu0 %1036 }
 0x3cf   : > { %v839_v61 = vmul.f32 %v2544_v57, %v2536_v42  ;;  %2547 = vrcp.f32 %v1037_v59 }
 0x3d0   : > { %v2546_v58 = vpop.eup %2545 }
 0x3d1   : > { %v838_v60 = vmul.f32 %v2546_v58, %v2538_v45 }
 0x3d2   : > { %v1147_v62 = vpop.permute.xlu0 %1146 }
 0x3d3   : > { %2310 = vmatprep.mubr.msk.f32.mxu0 %vm817_vm3, %v838_v60 }
 0x3d4   : > { %2311 = vmatmul.mubr.msk.f32.vlgmr.msra.gmra.mxu0 %vm817_vm3, %v839_v61 }
 0x3d5   : > { %2321 = vmatpush3.msra.mxu0 %v1045_v46 }
 0x3d6   : > { %2322 = vmatprep.subr.mxu0 %v1043_v54  ;;  %v1141_v5 = vpop.permute.xlu0 %1140 }
 0x3d7   : > { %2323 = vmatpush3.msra.mxu0 %v1043_v54 }
 0x3d8   : > { %2327 = vmatprep.subr.msk.mxu0 %vm733_vm2, %v1147_v62 }
 0x3dc   : > { %v2548_v1 = vpop.eup %2547 }
 0x3dd   : > { %v1041_v4 = vmul.f32 %v2548_v1, %v2540_v48 }
 0x3f7   : > { %v1034_v0 = vpop.xlane.xlu1 %1033 }
 0x3f8   : > { %2549 = vrcp.f32 %v1034_v0 }
 0x3fb   : > { %v1143_v6 = vpop.permute.xlu1 %1142 }
 0x405   : > { %v2550_v2 = vpop.eup %2549 }
 0x406   : > { %v1040_v3 = vmul.f32 %v2550_v2, %v2542_v52 }
 0x408   : > { %2324 = vmatprep.mubr.msk.f32.mxu0 %vm817_vm3, %v1040_v3 }
 0x409   : > { %2325 = vmatmul.mubr.msk.f32.vlgmr.msra.gmra.mxu0 %vm817_vm3, %v1041_v4  ;;  %v1566_v4 = vld [vmem:[%s3151_s22 + $0x10] sm:$0xff] }
 0x40a   : > { %2328 = vmatpush3.xpose.msk.msra.mxu0 %vm733_vm2, %v1147_v62  ;;  %2331 = vmatprep.mubr.msk.f32.mxu0 %vm733_vm2, %v1141_v5  ;;  %v1565_v5 = vld [vmem:[%s3151_s22 + $0x8] sm:$0xff] }
 0x40b   : > { %2329 = vmatprep.subr.msk.mxu0 %vm733_vm2, %v1145_v63 }
 0x40e   : > { %2330 = vmatpush3.xpose.msk.msra.mxu0 %vm733_vm2, %v1145_v63 }
 0x411   : > { %2332 = vmatmul.mubr.msk.f32.vlgmr.msra.gmra.mxu0 %vm733_vm2, %v1143_v6  ;;  %v1564_v6 = vld [vmem:[%s3151_s22] sm:$0xff] }
 0x494   : > { %v2312_v7 = vpop.f32.mrf.mxu0 }
 0x495   : > { %928 = vst.msk [vmem:[#allocation3 + $0x8] sm:$0xff] %vm733_vm2, %v2312_v7 }
 0x496   : > { %v918_v9 = vpop.f32.mrf.mxu0 }
 0x497   : > { %927 = vst.msk [vmem:[#allocation3] sm:$0xff] %vm733_vm2, %v918_v9 }
 0x4c9   : > { %v3247_v10 = vpop.f32.mrf.mxu0 }
 0x4cb   : > { %v3249_v12 = vpop.f32.mrf.mxu0 }
 0x4d1   : > { %v2333_v13 = vpop.f32.mrf.mxu0 }
 0x4d2   : > { %v1234_v15 = vsel %vm817_vm3, %v2333_v13, -inf }
 0x4d3   : > { %1235 = vmax.xlane.f32.xlu1 %v1234_v15  ;;  %v1222_v17 = vpop.f32.mrf.mxu0 }
 0x4d4   : > { %v1231_v18 = vsel %vm817_vm3, %v1222_v17, -inf }
 0x4d5   : > { %1232 = vmax.xlane.f32.xlu0 %v1231_v18 }
 0x4e4   : > { %1255 = vrot.lane.b32.xlu1 %v3195_v14, %s2828_s11 }
 0x4e8   : > { %1357 = vrot.lane.b32.xlu1 %v3195_v14, %s2829_s10 }
 0x4ec   : > { %1355 = vrot.lane.b32.xlu1 %v3197_v16, %s2829_s10 }
 0x4f0   : > { %1353 = vrot.lane.b32.xlu1 %v3195_v14, %s2830_s28 }
 0x55c   : > { %v1236_v19 = vpop.xlane.xlu1 %1235 }
 0x55d   : > { %v1238_v20 = vsub.f32 %v2333_v13, %v1236_v19 }
 0x55e   : > { %v1233_v21 = vpop.xlane.xlu0 %1232 }
 0x55f   : > { %v1241_v22 = vmul.f32 1.442695, %v1238_v20  ;;  %v1237_v23 = vsub.f32 %v1222_v17, %v1233_v21  ;;  %v2210_v17 = vld [vmem:[%s3128_s15] ss:$0 sm:$0xff] }
 0x560   : > { %v1256_v24 = vpop.permute.xlu1 %1255 }
 0x561   : > { %2551 = vpow2.f32 %v1241_v22  ;;  %v1239_v25 = vmul.f32 1.442695, %v1237_v23  ;;  %2334 = vmatprep.subr.mxu1 %v1256_v24 }
 0x562   : > { %2335 = vmatpush3.msra.mxu1 %v1256_v24 }
 0x563   : > { %2553 = vpow2.f32 %v1239_v25 }
 0x564   : > { %v1358_v33 = vpop.permute.xlu1 %1357 }
 0x568   : > { %v1356_v39 = vpop.permute.xlu1 %1355 }
 0x56c   : > { %v1354_v40 = vpop.permute.xlu1 %1353 }
 0x56e   : > { %v2552_v26 = vpop.eup %2551 }
 0x56f   : > { %v1246_v27 = vsel %vm817_vm3, %v2552_v26, 0.0 }
 0x570   : > { %v2554_v28 = vpop.eup %2553  ;;  %1247 = vadd.xlane.f32.xlu0 %v1246_v27 }
 0x571   : > { %v1243_v29 = vsel %vm817_vm3, %v2554_v28, 0.0 }
 0x574   : > { %1244 = vadd.xlane.f32.xlu0 %v1243_v29 }
 0x58a   : > { %1253 = vrot.lane.b32.xlu0 %v3197_v16, %s2828_s11 }
 0x58e   : > { %1351 = vrot.lane.b32.xlu0 %v3197_v16, %s2830_s28 }
 0x5f9   : > { %v1248_v30 = vpop.xlane.xlu0 %1247 }
 0x5fa   : > { %2555 = vrcp.f32 %v1248_v30 }
 0x5fd   : > { %v1245_v31 = vpop.xlane.xlu0 %1244 }
 0x5fe   : > { %2557 = vrcp.f32 %v1245_v31 }
 0x601   : > { %v1254_v32 = vpop.permute.xlu0 %1253 }
 0x602   : > { %2336 = vmatprep.subr.mxu1 %v1254_v32 }
 0x603   : > { %2337 = vmatpush3.msra.mxu1 %v1254_v32 }
 0x604   : > { %2341 = vmatprep.subr.msk.mxu1 %vm733_vm2, %v1358_v33 }
 0x605   : > { %v1352_v38 = vpop.permute.xlu0 %1351 }
 0x607   : > { %v2556_v34 = vpop.eup %2555 }
 0x608   : > { %v1252_v37 = vmul.f32 %v2556_v34, %v2552_v26  ;;  %v1701_v34 = vld [vmem:[%s3156_s1 + $0x18] sm:$0xff] }
 0x60b   : > { %v2558_v35 = vpop.eup %2557 }
 0x60c   : > { %v1251_v36 = vmul.f32 %v2558_v35, %v2554_v28  ;;  %v1700_v35 = vld [vmem:[%s3156_s1 + $0x10] sm:$0xff] }
 0x60e   : > { %2338 = vmatprep.mubr.msk.f32.mxu1 %vm817_vm3, %v1251_v36  ;;  %v1699_v36 = vld [vmem:[%s3156_s1 + $0x8] sm:$0xff] }
 0x60f   : > { %2339 = vmatmul.mubr.msk.f32.vlgmr.msra.gmra.mxu1 %vm817_vm3, %v1252_v37  ;;  %v1686_v37 = vlaneseq }
 0x610   : > { %2342 = vmatpush3.xpose.msk.msra.mxu1 %vm733_vm2, %v1358_v33  ;;  %2345 = vmatprep.mubr.msk.f32.mxu1 %vm733_vm2, %v1352_v38 }
 0x611   : > { %2343 = vmatprep.subr.msk.mxu1 %vm733_vm2, %v1356_v39  ;;  %v1687_v38 = vshrl.u32 %v1686_v37, 7 }
 0x614   : > { %2344 = vmatpush3.xpose.msk.msra.mxu1 %vm733_vm2, %v1356_v39  ;;  %v1698_v39 = vld [vmem:[%s3156_s1] sm:$0xff] }
 0x615   : > { %2366 = vmatprep.subr.mxu1 %v1701_v34 }
 0x617   : > { %2346 = vmatmul.mubr.msk.f32.vlgmr.msra.gmra.mxu1 %vm733_vm2, %v1354_v40  ;;  %v1919_v40 = vsub.s32 2, %v1687_v38 }
 0x618   : > { %2367 = vmatpush3.msra.mxu1 %v1701_v34 }
 0x619   : > { %2368 = vmatprep.subr.mxu1 %v1700_v35 }
 0x61a   : > { %2369 = vmatpush3.msra.mxu1 %v1700_v35 }
 0x61b   : > { %2370 = vmatprep.subr.mxu1 %v1699_v36 }
 0x61c   : > { %2371 = vmatpush3.msra.mxu1 %v1699_v36 }
 0x61d   : > { %2372 = vmatprep.subr.mxu1 %v1698_v39 }
 0x61e   : > { %2373 = vmatpush3.msra.mxu1 %v1698_v39 }
 0x6cf   : > { %v2340_v41 = vpop.f32.mrf.mxu1 }
 0x6d1   : > { %v1331_v42 = vpop.f32.mrf.mxu1 }
 0x6d7   : > { %v2347_v43 = vpop.f32.mrf.mxu1 }
 0x6d8   : > { %v1445_v44 = vsel %vm817_vm3, %v2347_v43, -inf }
 0x6d9   : > { %1446 = vmax.xlane.f32.xlu1 %v1445_v44  ;;  %v1433_v45 = vpop.f32.mrf.mxu1 }
 0x6da   : > { %v1442_v46 = vsel %vm817_vm3, %v1433_v45, -inf }
 0x6db   : > { %1443 = vmax.xlane.f32.xlu0 %v1442_v46  ;;  %v1798_v46 = vld [vmem:[%s3162_s17 + $0x30] sm:$0xff] }
 0x6ea   : > { %1466 = vrot.lane.b32.xlu1 %v3195_v14, %s2831_s14 }
 0x6ee   : > { %1131 = vrot.lane.b32.xlu1 %v3249_v12, %s2832_s0 }
 0x6f2   : > { %1133 = vrot.lane.b32.xlu1 %v3247_v10, %s2832_s0 }
 0x6f6   : > { %1344 = vrot.lane.b32.xlu1 %v2340_v41, %s2833_s5  ;;  %v1925_v41 = vsub.s32 3, %v1687_v38 }
 0x762   : > { %v1447_v47 = vpop.xlane.xlu1 %1446 }
 0x763   : > { %v1449_v48 = vsub.f32 %v2347_v43, %v1447_v47  ;;  %v1797_v47 = vld [vmem:[%s3162_s17 + $0x28] sm:$0xff] }
 0x764   : > { %v1444_v49 = vpop.xlane.xlu0 %1443 }
 0x765   : > { %v1452_v50 = vmul.f32 1.442695, %v1449_v48  ;;  %v1448_v51 = vsub.f32 %v1433_v45, %v1444_v49  ;;  %v1799_v45 = vld [vmem:[%s3162_s17 + $0x38] sm:$0xff]  ;;  %v1796_v48 = vld [vmem:[%s3162_s17 + $0x20] sm:$0xff] }
 0x766   : > { %v1467_v52 = vpop.permute.xlu1 %1466 }
 0x767   : > { %2559 = vpow2.f32 %v1452_v50  ;;  %v1450_v53 = vmul.f32 1.442695, %v1448_v51  ;;  %2348 = vmatprep.subr.mxu0 %v1467_v52 }
 0x768   : > { %2349 = vmatpush3.msra.mxu0 %v1467_v52 }
 0x769   : > { %2561 = vpow2.f32 %v1450_v53 }
 0x76a   : > { %v1132_v14 = vpop.permute.xlu1 %1131 }
 0x76b   : > { %1138 = vst.msk [vmem:[#allocation3] sm:$0xff] %vm1137_vm4, %v1132_v14 }
 0x76e   : > { %v1134_v54 = vpop.permute.xlu1 %1133 }
 0x76f   : > { %1139 = vst.msk [vmem:[#allocation3 + $0x8] sm:$0xff] %vm1137_vm4, %v1134_v54  ;;  %v1688_v54 = vsub.s32 0, %v1687_v38 }
 0x772   : > { %v1345_v55 = vpop.permute.xlu1 %1344 }
 0x773   : > { %1350 = vst.msk [vmem:[#allocation3 + $0x8] sm:$0xff] %vm1348_vm5, %v1345_v55  ;;  %v1694_v55 = vsub.s32 1, %v1687_v38 }
 0x774   : > { %v2560_v56 = vpop.eup %2559 }
 0x775   : > { %v1457_v57 = vsel %vm817_vm3, %v2560_v56, 0.0 }
 0x776   : > { %v2562_v58 = vpop.eup %2561  ;;  %1458 = vadd.xlane.f32.xlu0 %v1457_v57 }
 0x777   : > { %v1454_v59 = vsel %vm817_vm3, %v2562_v58, 0.0 }
 0x77a   : > { %1455 = vadd.xlane.f32.xlu0 %v1454_v59 }
 0x790   : > { %1464 = vrot.lane.b32.xlu0 %v3197_v16, %s2831_s14  ;;  %v1567_v16 = vld [vmem:[%s3151_s22 + $0x18] sm:$0xff] }
 0x794   : > { %1342 = vrot.lane.b32.xlu0 %v1331_v42, %s2833_s5  ;;  %v1656_v42 = vld [vmem:[%s3172_s4] sm:$0xf] }
 0x795   : > { %v3301_v43 = vrot.slane %v1656_v42, %v1919_v40  ;;  %v3303_v44 = vrot.slane %v1656_v42, %v1925_v41  ;;  %v1695_v59 = vrot.slane %v1656_v42, %v1694_v55 }
 0x7ff   : > { %v1459_v60 = vpop.xlane.xlu0 %1458 }
 0x800   : > { %2563 = vrcp.f32 %v1459_v60 }
 0x803   : > { %v1456_v61 = vpop.xlane.xlu0 %1455 }
 0x804   : > { %2565 = vrcp.f32 %v1456_v61 }
 0x807   : > { %v1465_v62 = vpop.permute.xlu0 %1464 }
 0x808   : > { %2350 = vmatprep.subr.mxu0 %v1465_v62 }
 0x809   : > { %2351 = vmatpush3.msra.mxu0 %v1465_v62 }
 0x80a   : > { %2355 = vmatprep.subr.mxu0 %v1567_v16 }
 0x80b   : > { %v1343_v63 = vpop.permute.xlu0 %1342 }
 0x80c   : > { %1349 = vst.msk [vmem:[#allocation3] sm:$0xff] %vm1348_vm5, %v1343_v63 }
 0x80d   : > { %v2564_v0 = vpop.eup %2563 }
 0x80e   : > { %v1463_v3 = vmul.f32 %v2564_v0, %v2560_v56  ;;  %v1689_v56 = vrot.slane %v1656_v42, %v1688_v54 }
 0x811   : > { %v2566_v1 = vpop.eup %2565 }
 0x812   : > { %v1462_v2 = vmul.f32 %v2566_v1, %v2562_v58 }
 0x814   : > { %2352 = vmatprep.mubr.msk.f32.mxu0 %vm817_vm3, %v1462_v2  ;;  %v1795_v2 = vld [vmem:[%s3162_s17 + $0x18] sm:$0xff] }
 0x815   : > { %2353 = vmatmul.mubr.msk.f32.vlgmr.msra.gmra.mxu0 %vm817_vm3, %v1463_v3  ;;  %v1794_v3 = vld [vmem:[%s3162_s17 + $0x10] sm:$0xff] }
 0x816   : > { %2356 = vmatpush3.msra.mxu0 %v1567_v16  ;;  %v1793_v16 = vld [vmem:[%s3162_s17 + $0x8] sm:$0xff] }
 0x817   : > { %2357 = vmatprep.subr.mxu0 %v1566_v4 }
 0x818   : > { %2358 = vmatpush3.msra.mxu0 %v1566_v4  ;;  %v1792_v4 = vld [vmem:[%s3162_s17] sm:$0xff] }
 0x819   : > { %2359 = vmatprep.subr.mxu0 %v1565_v5 }
 0x81a   : > { %2360 = vmatpush3.msra.mxu0 %v1565_v5  ;;  %v2213_v5 = vld [vmem:[%s3174_s20] ss:$0 sm:$0xff] }
 0x81b   : > { %2361 = vmatprep.subr.mxu0 %v1564_v6 }
 0x81c   : > { %2362 = vmatpush3.msra.mxu0 %v1564_v6 }
 0x81d   : > { %2377 = vmatprep.subr.mxu0 %v1799_v45 }
 0x8d5   : > { %v2354_v7 = vpop.f32.mrf.mxu0 }
 0x8d6   : > { %1555 = vrot.lane.b32.xlu1 %v2354_v7, %s2834_s7 }
 0x8d7   : > { %v1542_v9 = vpop.f32.mrf.mxu0 }
 0x8d8   : > { %1553 = vrot.lane.b32.xlu0 %v1542_v9, %s2834_s7 }
 0x948   : > { %v1556_v10 = vpop.permute.xlu1 %1555 }
 0x949   : > { %1561 = vst.msk [vmem:[#allocation3 + $0x8] sm:$0xff] %vm1559_vm6, %v1556_v10 }
 0x94a   : > { %v1554_v12 = vpop.permute.xlu0 %1553 }
 0x94b   : > { %1560 = vst.msk [vmem:[#allocation3] sm:$0xff] %vm1559_vm6, %v1554_v12 }
 0x950   : > { %v1563_v15 = vld [vmem:[#allocation3 + $0x8] sm:$0xff] }
 0x952   : > { %v1562_v13 = vld [vmem:[#allocation3] sm:$0xff] }
 0x953   : > { %2363 = vmatprep.mubr.msk.f32.mxu0 %vm645_vm1, %v1562_v13 }
 0x954   : > { %2364 = vmatmul.mubr.msk.f32.vlgmr.msra.gmra.mxu0 %vm645_vm1, %v1563_v15  ;;  %v2216_v15 = vld [vmem:[%s614_s2] ss:$0 sm:$0xff] }
 0x955   : > { %2378 = vmatpush3.msra.mxu0 %v1799_v45 }
 0x956   : > { %2379 = vmatprep.subr.mxu0 %v1798_v46 }
 0x957   : > { %2380 = vmatpush3.msra.mxu0 %v1798_v46 }
 0x958   : > { %2381 = vmatprep.subr.mxu0 %v1797_v47 }
 0x959   : > { %2382 = vmatpush3.msra.mxu0 %v1797_v47 }
 0x95a   : > { %2383 = vmatprep.subr.mxu0 %v1796_v48 }
 0x95b   : > { %2384 = vmatpush3.msra.mxu0 %v1796_v48 }
 0x95c   : > { %2385 = vmatprep.subr.mxu0 %v1795_v2 }
 0x95d   : > { %2386 = vmatpush3.msra.mxu0 %v1795_v2 }
 0x95e   : > { %2387 = vmatprep.subr.mxu0 %v1794_v3 }
 0x95f   : > { %2388 = vmatpush3.msra.mxu0 %v1794_v3 }
 0x960   : > { %2389 = vmatprep.subr.mxu0 %v1793_v16 }
 0x961   : > { %2390 = vmatpush3.msra.mxu0 %v1793_v16 }
 0x962   : > { %2391 = vmatprep.subr.mxu0 %v1792_v4 }
 0x963   : > { %2392 = vmatpush3.msra.mxu0 %v1792_v4 }
 0xa14   : > { %v2365_v18 = vpop.f32.mrf.mxu0 }
 0xa15   : > { %v1653_v19 = vadd.f32 %v2365_v18, %v2210_v17 }
 0xa16   : > { %v1647_v20 = vpop.f32.mrf.mxu0 }
 0xa17   : > { %v1648_v21 = vadd.f32 %v2210_v17, %v1647_v20  ;;  %v1658_v22 = vadd.f32 %v1653_v19, %v3186_v11 }
 0xa19   : > { %v1662_v23 = vsel %vm645_vm1, %v1658_v22, 0.0  ;;  %v1657_v24 = vadd.f32 %v1648_v21, %v3180_v8 }
 0xa1a   : > { %1663 = vadd.xlane.f32.xlu1 %v1662_v23 }
 0xa1b   : > { %v1659_v25 = vsel %vm645_vm1, %v1657_v24, 0.0 }
 0xa1c   : > { %1660 = vadd.xlane.f32.xlu0 %v1659_v25 }
 0xaa3   : > { %v1664_v26 = vpop.xlane.xlu1 %1663 }
 0xaa4   : > { %v1667_v27 = vmul.f32 0.03125, %v1664_v26 }
 0xaa5   : > { %v1661_v28 = vpop.xlane.xlu0 %1660 }
 0xaa6   : > { %v1666_v29 = vmul.f32 0.03125, %v1661_v28  ;;  %v1669_v30 = vsub.f32 %v1658_v22, %v1667_v27 }
 0xaa8   : > { %v1668_v31 = vsub.f32 %v1657_v24, %v1666_v29  ;;  %v1671_v33 = vmul.f32 %v1669_v30, %v1669_v30 }
 0xaaa   : > { %v1670_v32 = vmul.f32 %v1668_v31, %v1668_v31  ;;  %v1675_v8 = vsel %vm645_vm1, %v1671_v33, 0.0 }
 0xaac   : > { %v1672_v11 = vsel %vm645_vm1, %v1670_v32, 0.0 }
 0xaad   : > { %1673 = vadd.xlane.f32.xlu0 %v1672_v11 }
 0xab1   : > { %1676 = vadd.xlane.f32.xlu0 %v1675_v8 }
 0xb36   : > { %v1674_v49 = vpop.xlane.xlu0 %1673 }
 0xb37   : > { %v1678_v50 = vmul.f32 0.03125, %v1674_v49 }
 0xb39   : > { %v1680_v51 = vadd.f32 1e-05, %v1678_v50 }
 0xb3a   : > { %v1677_v52 = vpop.xlane.xlu0 %1676 }
 0xb3b   : > { %2567 = vrsqrt.f32 %v1680_v51  ;;  %v1679_v53 = vmul.f32 0.03125, %v1677_v52 }
 0xb3d   : > { %v1681_v14 = vadd.f32 1e-05, %v1679_v53 }
 0xb3f   : > { %2569 = vrsqrt.f32 %v1681_v14 }
 0xb48   : > { %v2568_v57 = vpop.eup %2567 }
 0xb49   : > { %v1684_v58 = vmul.f32 %v2568_v57, %v1668_v31 }
 0xb4b   : > { %v1690_v60 = vmul.f32 %v1689_v56, %v1684_v58 }
 0xb4c   : > { %v2570_v61 = vpop.eup %2569 }
 0xb4d   : > { %v1685_v62 = vmul.f32 %v2570_v61, %v1669_v30  ;;  %v1696_v63 = vadd.f32 %v1695_v59, %v1690_v60 }
 0xb4f   : > { %v1691_v0 = vmul.f32 %v1689_v56, %v1685_v62  ;;  %2374 = vmatprep.mubr.msk.f32.mxu1 %vm645_vm1, %v1696_v63 }
 0xb51   : > { %v1697_v1 = vadd.f32 %v1695_v59, %v1691_v0 }
 0xb53   : > { %2375 = vmatmul.mubr.msk.f32.vlgmr.msra.gmra.mxu1 %vm645_vm1, %v1697_v1 }
 0xc13   : > { %v2376_v6 = vpop.f32.mrf.mxu1 }
 0xc14   : > { %v1787_v7 = vadd.f32 %v2376_v6, %v2213_v5 }
 0xc15   : > { %v1781_v9 = vpop.f32.mrf.mxu1 }
 0xc16   : > { %v1782_v10 = vadd.f32 %v2213_v5, %v1781_v9  ;;  %v1791_v13 = vmax.f32 %v1787_v7, 0.0 }
 0xc18   : > { %v1790_v12 = vmax.f32 %v1782_v10, 0.0 }
 0xc1a   : > { %2393 = vmatprep.mubr.msk.f32.mxu0 %vm1807_vm7, %v1790_v12 }
 0xc1b   : > { %2394 = vmatmul.mubr.msk.f32.vlgmr.msra.gmra.mxu0 %vm1807_vm7, %v1791_v13 }
 0xcdb   : > { %v2395_v17 = vpop.f32.mrf.mxu0 }
 0xcdc   : > { %v1886_v18 = vadd.f32 %v2395_v17, %v2216_v15 }
 0xcdd   : > { %v1880_v19 = vpop.f32.mrf.mxu0 }
 0xcde   : > { %v1881_v20 = vadd.f32 %v2216_v15, %v1880_v19  ;;  %v1890_v21 = vadd.f32 %v1886_v18, %v1697_v1 }
 0xce0   : > { %v1894_v22 = vsel %vm645_vm1, %v1890_v21, 0.0  ;;  %v1889_v23 = vadd.f32 %v1881_v20, %v1696_v63 }
 0xce1   : > { %1895 = vadd.xlane.f32.xlu0 %v1894_v22 }
 0xce2   : > { %v1891_v24 = vsel %vm645_vm1, %v1889_v23, 0.0 }
 0xce3   : > { %1892 = vadd.xlane.f32.xlu1 %v1891_v24 }
 0xd6a   : > { %v1896_v25 = vpop.xlane.xlu0 %1895 }
 0xd6b   : > { %v1898_v26 = vmul.f32 0.03125, %v1896_v25 }
 0xd6c   : > { %v1893_v27 = vpop.xlane.xlu1 %1892 }
 0xd6d   : > { %v1900_v28 = vsub.f32 %v1890_v21, %v1898_v26  ;;  %v1897_v29 = vmul.f32 0.03125, %v1893_v27 }
 0xd6f   : > { %v1899_v30 = vsub.f32 %v1889_v23, %v1897_v29  ;;  %v1902_v31 = vmul.f32 %v1900_v28, %v1900_v28 }
 0xd71   : > { %v1906_v32 = vsel %vm645_vm1, %v1902_v31, 0.0  ;;  %v1901_v11 = vmul.f32 %v1899_v30, %v1899_v30 }
 0xd72   : > { %1907 = vadd.xlane.f32.xlu0 %v1906_v32 }
 0xd73   : > { %v1903_v33 = vsel %vm645_vm1, %v1901_v11, 0.0 }
 0xd74   : > { %1904 = vadd.xlane.f32.xlu1 %v1903_v33 }
 0xdfb   : > { %v1908_v8 = vpop.xlane.xlu0 %1907 }
 0xdfc   : > { %v1910_v34 = vmul.f32 0.03125, %v1908_v8 }
 0xdfd   : > { %v1905_v35 = vpop.xlane.xlu1 %1904 }
 0xdfe   : > { %v1912_v36 = vadd.f32 1e-05, %v1910_v34  ;;  %v1909_v37 = vmul.f32 0.03125, %v1905_v35 }
 0xe00   : > { %2571 = vrsqrt.f32 %v1912_v36  ;;  %v1911_v38 = vadd.f32 1e-05, %v1909_v37 }
 0xe02   : > { %2573 = vrsqrt.f32 %v1911_v38 }
 0xe0d   : > { %v2572_v39 = vpop.eup %2571 }
 0xe0e   : > { %v1916_v40 = vmul.f32 %v2572_v39, %v1900_v28 }
 0xe0f   : > { %v2574_v41 = vpop.eup %2573 }
 0xe10   : > { %v1922_v42 = vmul.f32 %v3301_v43, %v1916_v40  ;;  %v1915_v45 = vmul.f32 %v2574_v41, %v1899_v30 }
 0xe12   : > { %v1928_v46 = vadd.f32 %v3303_v44, %v1922_v42  ;;  %v1921_v47 = vmul.f32 %v3301_v43, %v1915_v45  ;;  %1934 = sbr.rel (%p2219_p11) target bundleno = 3625 (0xe29), region = 88 }
 0xe14   : > { %1930 = vst.msk [vmem:[#allocation2 + $0x8] sm:$0xff] %vm645_vm1, %v1928_v46  ;;  %v1927_v48 = vadd.f32 %v3303_v44, %v1921_v47 }
 0xe16   : > { %1929 = vst.msk [vmem:[#allocation2] sm:$0xff] %vm645_vm1, %v1927_v48 }
 0xe17   : > { %v1935_v49 = vsel %vm645_vm1, %v1927_v48, 0.0  ;;  %v1936_v50 = vsel %vm645_vm1, %v1928_v46, 0.0  ;;  %vm1946_vm8 = vcmask 253952  }
 0xe18   : > { %v1937_v51 = vadd.f32 %v1936_v50, %v1935_v49 }
 0xe1a   : > { %v1938_v52 = vrot.slane %v1937_v51, 4 }
 0xe1c   : > { %v1939_v53 = vadd.f32 %v1938_v52, %v1937_v51 }
 0xe1e   : > { %v1940_v14 = vrot.slane %v1939_v53, 2 }
 0xe20   : > { %v1941_v54 = vadd.f32 %v1940_v14, %v1939_v53 }
 0xe22   : > { %v1942_v43 = vrot.slane %v1941_v54, 1 }
 0xe24   : > { %v1943_v55 = vadd.f32 %v1942_v43, %v1941_v54 }
 0xe26   : > { %v1945_v56 = vmul.f32 0.0625, %v1943_v55 }
 0xe28   : > { %1947 = vst.msk [vmem:[%s587_s8] sm:$0x1] %vm1946_vm8, %v1945_v56 }
 0xe29 PF: > { %s3475_s2 = sld [smem:[#allocation21_spill]]  ;;  %s1961_s18 = sshll.u32 %s587_s8, 4  ;;  %s1962_s18 = int_to_ptr.vmem [resolvable:$true] %s1961_s18 }
 0xe2a   : > { %s3476_s22 = sld [smem:[#allocation38_spill]]  ;;  %s1949_s19 = scalar_lea.sflag [#allocation6], %s3116_s29 }
 0xe2b   : > { %s2685_s21 = scalar_lea.vmem %s1962_s18, 16  ;;  %p3478_p0 = scmp.ne.s32.totalorder %s3453_s9, 0 }
 0xe2c   : > { %p2686_p4 = scmp.ne.s32.totalorder %s1962_s18, %s2685_s21  ;;  %s2835_s25 = smov [#allocation11]  }
 0xe2d   : > { %s2689_s24 = sshll.u32 %s2835_s25, 4  ;;  %s2690_s24 = int_to_ptr.vmem [resolvable:$false] %s2689_s24 }
 0xe2e   : > { %p2687_p6 = pnand %p2686_p4, %p3478_p0  ;;  %s2691_s26 = scalar_lea.vmem %s2690_s24, 32 }
 0xe2f   : > { %s2220_s20 = sshll.u32 %s3475_s2, 4  ;;  %p2692_p10 = scmp.lt.s32.totalorder %s1962_s18, %s2690_s24 }
 0xe30   : > { %s3477_s16 = smov %s3476_s22  ;;  %s1959_s17 = scalar_lea.hbm %s3476_s22, %s2220_s20 }
 0xe31   : > { %p2688_p8 = pneg %p2687_p6  ;;  %p2693_p2 = scmp.lt.s32.totalorder %s2691_s26, %s2685_s21 }
 0xe33   : > { %p2694_p13 = por %p2693_p2, %p2692_p10 }
 0xe35   : > { %p2695_p1 = pnand %p2694_p13, %p2688_p8 }
 0xe37   : > { %2698 = shalt.err (!%p2695_p1)
}
 0xe38   : > { %s2699_s30 = scalar_lea.hbm %s1959_s17, 16  ;;  %s2703_s12 = scalar_lea.hbm %s3477_s16, 32 }
 0xe39   : > { %p2700_p7 = scmp.ne.s32.totalorder %s1959_s17, %s2699_s30  ;;  %p2704_p3 = scmp.lt.s32.totalorder %s1959_s17, %s3477_s16 }
 0xe3a   : > { %p2705_p5 = scmp.lt.s32.totalorder %s2703_s12, %s2699_s30 }
 0xe3b   : > { %p2701_p9 = pnand %p2700_p7, %p3478_p0 }
 0xe3c   : > { %p2706_p11 = por %p2705_p5, %p2704_p3 }
 0xe3d   : > { %p2702_p12 = pneg %p2701_p9 }
 0xe3f   : > { %p2707_p4 = pnand %p2706_p11, %p2702_p12 }
 0xe41   : > { %2710 = shalt.err (!%p2707_p4)
}
 0xe42   : > { %2406 = dma.vmem_to_hbm [thread:$0]  (%p3478_p0), %s1962_s18, 16, %s1959_s17, %s1949_s19  }
 0xe43 PF: > { %s3479_s28 = sld [smem:[#allocation18_spill]]  ;;  %p2429_p6 = scmp.ge.s32.totalorder %s2813_s27, 2 }
 0xe44   : > { %s3480_s14 = sld [smem:[#allocation28_spill]] }
 0xe49   : > { %s1973_s0 = sand.u32 1, %s3479_s28  }
 0xe4a   : > { %p3481_p8 = scmp.ne.s32.totalorder %s3480_s14, 0  ;;  %s1974_s5 = scalar_lea.sflag [#allocation6], %s1973_s0 }
 0xe4c   : > { %p2423_p10 = pnand %p2429_p6, %p3481_p8 }
 0xe4e   : > { %p2424_p2 = pneg %p2423_p10 }
 0xe50   : > { %2768 = dma.done.wait (%p2424_p2), %s1974_s5, 16  }
 0xe51   : > { %2770 = vsyncadd (%p2424_p2), %s1974_s5, 4294967280  ;;  %s28_s27 = sadd.s32 1, %s2813_s27   ;;  %s3482_s17 = sld [smem:[#allocation16_spill]] }
 0xe52   : > { %p25_p13 = scmp.ge.s32.totalorder %s28_s27, 6   ;;  %s3483_s18 = sld [smem:[#allocation17_spill]] }
 0xe53   : > { %s3484_s19 = sld [smem:[#allocation26_spill]] }
 0xe54   : > { %s3485_s20 = sld [smem:[#allocation19_spill]] }
 0xe55   : > { %s3486_s21 = sld [smem:[#allocation20_spill]] }
 0xe56   : > { %s3487_s22 = sld [smem:[#allocation27_spill]]  ;;  %27 = sbr.rel (!%p25_p13) target bundleno = 21 (0x15), region = 164 }
 0xe57   : > { %s3488_s23 = sld [smem:[#allocation22_spill]] }
 0xe58   : > { %s3489_s24 = sld [smem:[#allocation23_spill]] }
 0xe59   : > { %s3490_s25 = sld [smem:[#allocation24_spill]] }
 0xe5a   : > { %s3491_s26 = sld [smem:[#allocation25_spill]] }
 0xe5b   :  { %1978 = vsyncpa [#allocation5], 1 }
 0xe5c   :  { %1980 = vsyncpa [#allocation5 + $0x1], 1 }
 0xe5d   :  { %1981 = vsyncpa [#allocation8], 1 }
 0xe5e   :  { %1982 = vsyncpa [#allocation6], 1 }
 0xe5f   :  { %1984 = vsyncpa [#allocation6 + $0x1], 1 }

</bundles_post_ra>
